<compile_context>
chip_gen: v6e
topology: v6e:2x2x1
jax: 0.10.0
libtpu: 0.0.40
codegen_flags: <defaults>
</compile_context>

<pallas_src>
import functools

import jax
import jax.numpy as jnp
from jax import lax
from jax.experimental import pallas as pl
from jax.experimental.pallas import tpu as pltpu

EPS = 1e-5


# ----------------------------------------------------------------------------
# Fused kernel: expand(1x1)+ReLU6 -> dw(3x3, stride)+ReLU6 -> proj(1x1)(+res)
# (BN scales pre-folded into weights; biases added in-kernel.)
# ----------------------------------------------------------------------------
def _fused_ir_kernel(*refs, W, Wo, TR, IR, stride, has_expand, identity, bot_pad):
    if has_expand:
        (x_ref, w_exp_ref, b1_ref,
         w_dw_ref, b2_ref,
         w_proj_ref, b3_ref,
         o_ref, xe_scr) = refs
    else:
        (x_ref,
         w_dw_ref, b2_ref,
         w_proj_ref, b3_ref,
         o_ref, xe_scr) = refs

    r = pl.program_id(1)
    R = pl.num_programs(1)
    Ch = xe_scr.shape[-1]

    # ---- stage 1: expanded activation for this row tile (incl. 1-row halo).
    # x was pre-padded with one zero row top & bottom in the wrapper, so the
    # window read below is always in bounds; the values computed for padding
    # rows are wrong (= clip(b1)) and are re-zeroed under pl.when below.
    row0 = stride * r * TR                         # first padded-x row of window
    start = pl.multiple_of(row0 * W, TR * W)
    xw = x_ref[0, pl.ds(start, IR * W), :]         # (IR*W, Cin) bf16
    if has_expand:
        e = jnp.dot(xw, w_exp_ref[...], preferred_element_type=jnp.float32)
        e = jnp.clip(e + b1_ref[...], 0.0, 6.0)    # (IR*W, Ch) f32
    else:
        e = xw.astype(jnp.float32)
    # interior columns start at sublane offset 8 -> aligned (unmasked) stores
    xe_scr[:, 8:8 + W, :] = e.reshape(IR, W, Ch)

    # zero halo columns (tiny: 2 * IR * Ch elems; interior never touches them)
    zero_col = jnp.zeros((IR, 1, Ch), jnp.float32)
    xe_scr[:, 7:8, :] = zero_col
    xe_scr[:, 8 + W:9 + W, :] = zero_col

    zero_row = jnp.zeros((1, W, Ch), jnp.float32)

    @pl.when(r == 0)
    def _():                                       # top image padding row
        xe_scr[0:1, 8:8 + W, :] = zero_row

    if bot_pad:
        @pl.when(r == R - 1)
        def _():                                   # bottom image padding row
            xe_scr[IR - 1:IR, 8:8 + W, :] = zero_row

    # ---- stage 2: 3x3 depthwise conv (BN scale folded into taps), register
    # accumulation, in-kernel stride via strided ref reads.
    acc = None
    for ki in range(3):
        for kj in range(3):
            if stride == 1:
                tap = xe_scr[ki:ki + TR, 7 + kj:7 + kj + W, :]
            else:
                tap = xe_scr[pl.ds(ki, TR, stride=stride),
                             pl.ds(7 + kj, Wo, stride=stride), :]
            w_tap = w_dw_ref[ki * 3 + kj:ki * 3 + kj + 1, :]     # (1, Ch) f32
            contrib = tap * w_tap
            acc = contrib if acc is None else acc + contrib
    dwv = jnp.clip(acc + b2_ref[...], 0.0, 6.0)                  # (TR, Wo, Ch)

    # ---- stage 3: projection 1x1 conv (BN folded) + bias (+ fused residual)
    d2d = dwv.reshape(TR * Wo, Ch).astype(jnp.bfloat16)          # bf16 MXU feed
    y = jnp.dot(d2d, w_proj_ref[...], preferred_element_type=jnp.float32)
    y = y + b3_ref[...]
    if identity:
        res_start = pl.multiple_of((r * TR + 1) * W, W)          # skip top pad row
        res = x_ref[0, pl.ds(res_start, TR * W), :]
        y = y + res.astype(jnp.float32)
    o_ref[...] = y[None].astype(o_ref.dtype)


# ----------------------------------------------------------------------------
# Host-side BN folding (exact in f32); returns tensors exactly as stored by the
# kernel (bf16 matmul weights, f32 depthwise taps and biases).
# ----------------------------------------------------------------------------
def fold_params(p, t):
    has_expand = (t != 1)
    Ch = p["w_dw"].shape[-1]
    q = {}
    if has_expand:
        q["w_exp"] = (p["w_expand"] * p["s1"][None, :]).astype(jnp.bfloat16)
        q["b1"] = p["b1"].astype(jnp.float32)
    q["w_dw"] = (p["w_dw"].reshape(9, Ch) * p["s2"][None, :]).astype(jnp.float32)
    q["b2"] = p["b2"].astype(jnp.float32)
    q["w_proj"] = (p["w_proj"] * p["s3"][None, :]).astype(jnp.bfloat16)
    q["b3"] = p["b3"].astype(jnp.float32)
    return q


# ----------------------------------------------------------------------------
# Wrapper
# ----------------------------------------------------------------------------
def inverted_residual_pallas(x_nchw, p, *, stride, t, max_row_tile=8):
    assert stride in (1, 2)
    N, Cin, H, W = x_nchw.shape
    Cout = p["w_proj"].shape[1]
    Ch = p["w_dw"].shape[-1]
    has_expand = (t != 1)
    identity = (stride == 1) and (Cin == Cout)
    Ho = (H - 1) // stride + 1
    Wo = (W - 1) // stride + 1

    # Output-row tile: largest divisor of Ho that is <= max_row_tile.
    TR = 1
    for cand in range(1, min(Ho, max_row_tile) + 1):
        if Ho % cand == 0:
            TR = cand
    R = Ho // TR
    IR = stride * (TR - 1) + 3                         # input rows per tile (with halo)
    bot_pad = max(0, stride * (Ho - 1) + 2 - H)        # bottom image padding rows (0/1)
    Wp = ((W + 9 + 7) // 8) * 8                        # scratch width; interior at col 8

    bf16 = jnp.bfloat16
    f32 = jnp.float32
    q = fold_params(p, t)

    # Single NCHW->NHWC layout pass at the block boundary; pad one zero row on
    # top/bottom so every row-tile window read is in bounds; flatten rows so the
    # kernel sees a (rows*W, Cin) matmul operand without in-kernel relayout.
    x = jnp.transpose(x_nchw, (0, 2, 3, 1)).astype(bf16)
    x = jnp.pad(x, ((0, 0), (1, 1), (0, 0), (0, 0)))
    x = x.reshape(N, (H + 2) * W, Cin)

    def _const(a):
        return pl.BlockSpec(a.shape, lambda n, r, nd=a.ndim: (0,) * nd)

    args = [x]
    in_specs = [pl.BlockSpec((1, (H + 2) * W, Cin), lambda n, r: (n, 0, 0))]

    if has_expand:
        b1 = q["b1"].reshape(1, Ch)
        args += [q["w_exp"], b1]
        in_specs += [_const(q["w_exp"]), _const(b1)]

    b2 = q["b2"].reshape(1, Ch)
    b3 = q["b3"].reshape(1, Cout)
    args += [q["w_dw"], b2, q["w_proj"], b3]
    in_specs += [_const(q["w_dw"]), _const(b2), _const(q["w_proj"]), _const(b3)]

    kernel = functools.partial(
        _fused_ir_kernel, W=W, Wo=Wo, TR=TR, IR=IR, stride=stride,
        has_expand=has_expand, identity=identity, bot_pad=bot_pad)

    out2d = pl.pallas_call(
        kernel,
        out_shape=jax.ShapeDtypeStruct((N, Ho * Wo, Cout), f32),
        grid=(N, R),
        in_specs=in_specs,
        out_specs=pl.BlockSpec((1, TR * Wo, Cout), lambda n, r: (n, r, 0)),
        scratch_shapes=[
            pltpu.VMEM((IR, Wp, Ch), jnp.float32),     # row tile of padded expanded act.
        ],
        compiler_params=pltpu.CompilerParams(
            dimension_semantics=("parallel", "parallel"),
            vmem_limit_bytes=64 * 1024 * 1024),        # actual usage is far below this
    )(*args)

    out = out2d.reshape(N, Ho, Wo, Cout)
    return jnp.transpose(out, (0, 3, 1, 2))            # back to NCHW, f32


# ----------------------------------------------------------------------------
# Deterministic parameter init (synthetic; no checkpoint load). BN folded.
# ----------------------------------------------------------------------------
def init_params(key, in_channels, out_channels, t):
    hidden = round(in_channels * t)
    keys = jax.random.split(key, 16)

    def bn_fold(k0, k1, k2, k3, c):
        gamma = 1.0 + 0.1 * jax.random.normal(k0, (c,))
        beta = 0.1 * jax.random.normal(k1, (c,))
        mean = 0.1 * jax.random.normal(k2, (c,))
        var = jax.random.uniform(k3, (c,), minval=0.5, maxval=1.5)
        scale = gamma / jnp.sqrt(var + EPS)
        bias = beta - mean * scale
        return scale.astype(jnp.float32), bias.astype(jnp.float32)

    p = {}
    i = 0
    if t != 1:
        p["w_expand"] = (0.1 * jax.random.normal(keys[i], (in_channels, hidden))).astype(jnp.float32); i += 1
        p["s1"], p["b1"] = bn_fold(keys[i], keys[i + 1], keys[i + 2], keys[i + 3], hidden); i += 4
    p["w_dw"] = (0.1 * jax.random.normal(keys[i], (3, 3, hidden))).astype(jnp.float32); i += 1
    p["s2"], p["b2"] = bn_fold(keys[i], keys[i + 1], keys[i + 2], keys[i + 3], hidden); i += 4
    p["w_proj"] = (0.1 * jax.random.normal(keys[i], (hidden, out_channels))).astype(jnp.float32); i += 1
    p["s3"], p["b3"] = bn_fold(keys[i], keys[i + 1], keys[i + 2], keys[i + 3], out_channels)
    return p


# ----------------------------------------------------------------------------
# Pure-JAX reference (lax convs, NCHW) mirroring the kernel's numeric path
# (same folded weights, same bf16 storage points, f32 accumulation).
# ----------------------------------------------------------------------------
def reference(x_nchw, p, stride, t):
    q = fold_params(p, t)
    hi = lax.Precision.HIGHEST

    x = x_nchw.astype(jnp.bfloat16).astype(jnp.float32)
    h = x
    if t != 1:
        w = q["w_exp"].astype(jnp.float32)                       # (Cin, Ch)
        h = lax.conv_general_dilated(
            h, jnp.transpose(w)[:, :, None, None], (1, 1), "VALID",
            dimension_numbers=("NCHW", "OIHW", "NCHW"), precision=hi)
        h = jnp.clip(h + q["b1"][None, :, None, None], 0.0, 6.0)

    wd = q["w_dw"].astype(jnp.float32).reshape(3, 3, -1)         # (3, 3, Ch)
    C = wd.shape[-1]
    wd_oihw = jnp.transpose(wd, (2, 0, 1))[:, None, :, :]
    h = lax.conv_general_dilated(
        h, wd_oihw, (stride, stride), ((1, 1), (1, 1)),
        dimension_numbers=("NCHW", "OIHW", "NCHW"),
        feature_group_count=C, precision=hi)
    h = jnp.clip(h + q["b2"][None, :, None, None], 0.0, 6.0)
    h = h.astype(jnp.bfloat16).astype(jnp.float32)               # kernel feeds proj in bf16

    wp = q["w_proj"].astype(jnp.float32)                         # (Ch, Cout)
    h = lax.conv_general_dilated(
        h, jnp.transpose(wp)[:, :, None, None], (1, 1), "VALID",
        dimension_numbers=("NCHW", "OIHW", "NCHW"), precision=hi)
    h = h + q["b3"][None, :, None, None]

    if stride == 1 and x_nchw.shape[1] == wp.shape[1]:
        h = h + x
    return h


if __name__ == "__main__":
    key = jax.random.PRNGKey(0)

    configs = [
        # (N, Cin, H,  W,  Cout, stride, t)
        (2, 4, 16, 16, 4, 1, 4),   # expand + identity residual, 2 row tiles
        (2, 4, 16, 16, 8, 2, 6),   # expand + in-kernel stride-2 depthwise
        (2, 8, 16, 16, 8, 1, 1),   # t == 1 (no expand) + identity residual
    ]
    for idx, (N, Cin, H, W, Cout, stride, t) in enumerate(configs):
        kx, kp, key = jax.random.split(key, 3)
        x = jax.random.normal(kx, (N, Cin, H, W), dtype=jnp.float32)
        params = init_params(kp, Cin, Cout, t)

        out = inverted_residual_pallas(x, params, stride=stride, t=t)
        out = jax.block_until_ready(out)

        ref = reference(x, params, stride, t)
        assert out.shape == ref.shape, (idx, out.shape, ref.shape)
        max_err = float(jnp.max(jnp.abs(out - ref)))
        assert jnp.allclose(out, ref, atol=2e-2, rtol=2e-2), (idx, max_err)

    print("KERNEL_OK")
</pallas_src>

<mosaic_0001>
module attributes {stable_mosaic.version = 11 : i64} {
  func.func @_fused_ir_kernel(%arg0: i32, %arg1: i32, %arg2: memref<1x288x4xbf16, #tpu.memory_space<vmem>>, %arg3: memref<4x16xbf16, #tpu.memory_space<vmem>>, %arg4: memref<1x16xf32, #tpu.memory_space<vmem>>, %arg5: memref<9x16xf32, #tpu.memory_space<vmem>>, %arg6: memref<1x16xf32, #tpu.memory_space<vmem>>, %arg7: memref<16x4xbf16, #tpu.memory_space<vmem>>, %arg8: memref<1x4xf32, #tpu.memory_space<vmem>>, %arg9: memref<1x128x4xf32, #tpu.memory_space<vmem>>, %arg10: memref<10x32x16xf32, #tpu.memory_space<vmem>>) attributes {dimension_semantics = [#tpu.dimension_semantics<parallel>, #tpu.dimension_semantics<parallel>], iteration_bounds = array<i64: 2, 2>, scalar_prefetch = 0 : i64, scratch_operands = 1 : i64, tpu.core_type = #tpu.core_type<tc>, window_params = [{transform_indices = @transform_0, window_bounds = array<i64: 1, 288, 4>}, {pipeline_mode = #tpu.pipeline_mode<synchronous>, transform_indices = @transform_1, window_bounds = array<i64: 4, 16>}, {pipeline_mode = #tpu.pipeline_mode<synchronous>, transform_indices = @transform_2, window_bounds = array<i64: 1, 16>}, {pipeline_mode = #tpu.pipeline_mode<synchronous>, transform_indices = @transform_3, window_bounds = array<i64: 9, 16>}, {pipeline_mode = #tpu.pipeline_mode<synchronous>, transform_indices = @transform_4, window_bounds = array<i64: 1, 16>}, {pipeline_mode = #tpu.pipeline_mode<synchronous>, transform_indices = @transform_5, window_bounds = array<i64: 16, 4>}, {pipeline_mode = #tpu.pipeline_mode<synchronous>, transform_indices = @transform_6, window_bounds = array<i64: 1, 4>}, {transform_indices = @transform_7, window_bounds = array<i64: 1, 128, 4>}]} {
    %c1_i32 = arith.constant 1 : i32
    %0 = arith.muli %c1_i32, %arg1 : i32
    %c8_i32 = arith.constant 8 : i32
    %1 = arith.muli %0, %c8_i32 : i32
    %c16_i32 = arith.constant 16 : i32
    %2 = arith.muli %1, %c16_i32 : i32
    %3 = tpu.assume_multiple %2, 128 : i32
    %c0 = arith.constant 0 : index
    %4 = arith.index_cast %3 : i32 to index
    %c0_0 = arith.constant 0 : index
    %5 = vector.load %arg2[%c0, %4, %c0_0] : memref<1x288x4xbf16, #tpu.memory_space<vmem>>, vector<1x160x4xbf16>
    %6 = vector.shape_cast %5 : vector<1x160x4xbf16> to vector<160x4xbf16>
    %c0_1 = arith.constant 0 : index
    %c0_2 = arith.constant 0 : index
    %7 = vector.load %arg3[%c0_1, %c0_2] : memref<4x16xbf16, #tpu.memory_space<vmem>>, vector<4x16xbf16>
    %cst = arith.constant dense<0.000000e+00> : vector<160x16xf32>
    %8 = tpu.matmul %6, %7, %cst {dimension_numbers = #tpu.dot_dimension_numbers<[1], [0], [0], [1], [0, 0, 1, 1], [], []>} : vector<160x4xbf16>, vector<4x16xbf16>, vector<160x16xf32> -> vector<160x16xf32>
    %c0_3 = arith.constant 0 : index
    %c0_4 = arith.constant 0 : index
    %9 = vector.load %arg4[%c0_3, %c0_4] : memref<1x16xf32, #tpu.memory_space<vmem>>, vector<1x16xf32>
    %10 = vector.broadcast %9 : vector<1x16xf32> to vector<160x16xf32>
    %11 = arith.addf %8, %10 : vector<160x16xf32>
    %cst_5 = arith.constant 0.000000e+00 : f32
    %cst_6 = arith.constant 6.000000e+00 : f32
    %12 = vector.broadcast %cst_5 : f32 to vector<160x16xf32>
    %13 = arith.maximumf %12, %11 : vector<160x16xf32>
    %14 = vector.broadcast %cst_6 : f32 to vector<160x16xf32>
    %15 = arith.minimumf %14, %13 : vector<160x16xf32>
    %16 = vector.shape_cast %15 : vector<160x16xf32> to vector<10x16x16xf32>
    %c0_7 = arith.constant 0 : index
    %c8 = arith.constant 8 : index
    %c0_8 = arith.constant 0 : index
    %17 = vector.load %arg10[%c0_7, %c8, %c0_8] : memref<10x32x16xf32, #tpu.memory_space<vmem>>, vector<10x16x16xf32>
    tpu.vector_store %arg10[%c0_7, %c8, %c0_8], %16 {strides = array<i32>} : memref<10x32x16xf32, #tpu.memory_space<vmem>>, vector<10x16x16xf32>,
    %cst_9 = arith.constant 0.000000e+00 : f32
    %18 = vector.broadcast %cst_9 : f32 to vector<10x1x16xf32>
    %c0_10 = arith.constant 0 : index
    %c7 = arith.constant 7 : index
    %c0_11 = arith.constant 0 : index
    %19 = vector.load %arg10[%c0_10, %c7, %c0_11] : memref<10x32x16xf32, #tpu.memory_space<vmem>>, vector<10x1x16xf32>
    tpu.vector_store %arg10[%c0_10, %c7, %c0_11], %18 {strides = array<i32>} : memref<10x32x16xf32, #tpu.memory_space<vmem>>, vector<10x1x16xf32>,
    %c0_12 = arith.constant 0 : index
    %c24 = arith.constant 24 : index
    %c0_13 = arith.constant 0 : index
    %20 = vector.load %arg10[%c0_12, %c24, %c0_13] : memref<10x32x16xf32, #tpu.memory_space<vmem>>, vector<10x1x16xf32>
    tpu.vector_store %arg10[%c0_12, %c24, %c0_13], %18 {strides = array<i32>} : memref<10x32x16xf32, #tpu.memory_space<vmem>>, vector<10x1x16xf32>,
    %cst_14 = arith.constant 0.000000e+00 : f32
    %21 = vector.broadcast %cst_14 : f32 to vector<1x16x16xf32>
    %c0_i32 = arith.constant 0 : i32
    %22 = arith.cmpi eq, %arg1, %c0_i32 : i32
    %23 = arith.extui %22 : i1 to i32
    %c0_i32_15 = arith.constant 0 : i32
    %24 = arith.cmpi ne, %23, %c0_i32_15 : i32
    scf.if %24 {
      %c0_73 = arith.constant 0 : index
      %c8_74 = arith.constant 8 : index
      %c0_75 = arith.constant 0 : index
      %107 = vector.load %arg10[%c0_73, %c8_74, %c0_75] : memref<10x32x16xf32, #tpu.memory_space<vmem>>, vector<1x16x16xf32>
      tpu.vector_store %arg10[%c0_73, %c8_74, %c0_75], %21 {strides = array<i32>} : memref<10x32x16xf32, #tpu.memory_space<vmem>>, vector<1x16x16xf32>,
    } else {
    }
    %c1_i32_16 = arith.constant 1 : i32
    %25 = arith.cmpi eq, %arg1, %c1_i32_16 : i32
    %26 = arith.extui %25 : i1 to i32
    %c0_i32_17 = arith.constant 0 : i32
    %27 = arith.cmpi ne, %26, %c0_i32_17 : i32
    scf.if %27 {
      %c9_73 = arith.constant 9 : index
      %c8_74 = arith.constant 8 : index
      %c0_75 = arith.constant 0 : index
      %107 = vector.load %arg10[%c9_73, %c8_74, %c0_75] : memref<10x32x16xf32, #tpu.memory_space<vmem>>, vector<1x16x16xf32>
      tpu.vector_store %arg10[%c9_73, %c8_74, %c0_75], %21 {strides = array<i32>} : memref<10x32x16xf32, #tpu.memory_space<vmem>>, vector<1x16x16xf32>,
    } else {
    }
    %c0_18 = arith.constant 0 : index
    %c7_19 = arith.constant 7 : index
    %c0_20 = arith.constant 0 : index
    %28 = vector.load %arg10[%c0_18, %c7_19, %c0_20] : memref<10x32x16xf32, #tpu.memory_space<vmem>>, vector<8x16x16xf32>
    %c0_21 = arith.constant 0 : index
    %c0_22 = arith.constant 0 : index
    %29 = vector.load %arg5[%c0_21, %c0_22] : memref<9x16xf32, #tpu.memory_space<vmem>>, vector<1x16xf32>
    %30 = vector.shape_cast %29 : vector<1x16xf32> to vector<1x1x16xf32>
    %31 = vector.broadcast %30 : vector<1x1x16xf32> to vector<8x16x16xf32>
    %32 = arith.mulf %28, %31 : vector<8x16x16xf32>
    %c0_23 = arith.constant 0 : index
    %c8_24 = arith.constant 8 : index
    %c0_25 = arith.constant 0 : index
    %33 = vector.load %arg10[%c0_23, %c8_24, %c0_25] : memref<10x32x16xf32, #tpu.memory_space<vmem>>, vector<8x16x16xf32>
    %c1 = arith.constant 1 : index
    %c0_26 = arith.constant 0 : index
    %34 = vector.load %arg5[%c1, %c0_26] : memref<9x16xf32, #tpu.memory_space<vmem>>, vector<1x16xf32>
    %35 = vector.shape_cast %34 : vector<1x16xf32> to vector<1x1x16xf32>
    %36 = vector.broadcast %35 : vector<1x1x16xf32> to vector<8x16x16xf32>
    %37 = arith.mulf %33, %36 : vector<8x16x16xf32>
    %38 = arith.addf %32, %37 : vector<8x16x16xf32>
    %c0_27 = arith.constant 0 : index
    %c9 = arith.constant 9 : index
    %c0_28 = arith.constant 0 : index
    %39 = vector.load %arg10[%c0_27, %c9, %c0_28] : memref<10x32x16xf32, #tpu.memory_space<vmem>>, vector<8x16x16xf32>
    %c2 = arith.constant 2 : index
    %c0_29 = arith.constant 0 : index
    %40 = vector.load %arg5[%c2, %c0_29] : memref<9x16xf32, #tpu.memory_space<vmem>>, vector<1x16xf32>
    %41 = vector.shape_cast %40 : vector<1x16xf32> to vector<1x1x16xf32>
    %42 = vector.broadcast %41 : vector<1x1x16xf32> to vector<8x16x16xf32>
    %43 = arith.mulf %39, %42 : vector<8x16x16xf32>
    %44 = arith.addf %38, %43 : vector<8x16x16xf32>
    %c1_30 = arith.constant 1 : index
    %c7_31 = arith.constant 7 : index
    %c0_32 = arith.constant 0 : index
    %45 = vector.load %arg10[%c1_30, %c7_31, %c0_32] : memref<10x32x16xf32, #tpu.memory_space<vmem>>, vector<8x16x16xf32>
    %c3 = arith.constant 3 : index
    %c0_33 = arith.constant 0 : index
    %46 = vector.load %arg5[%c3, %c0_33] : memref<9x16xf32, #tpu.memory_space<vmem>>, vector<1x16xf32>
    %47 = vector.shape_cast %46 : vector<1x16xf32> to vector<1x1x16xf32>
    %48 = vector.broadcast %47 : vector<1x1x16xf32> to vector<8x16x16xf32>
    %49 = arith.mulf %45, %48 : vector<8x16x16xf32>
    %50 = arith.addf %44, %49 : vector<8x16x16xf32>
    %c1_34 = arith.constant 1 : index
    %c8_35 = arith.constant 8 : index
    %c0_36 = arith.constant 0 : index
    %51 = vector.load %arg10[%c1_34, %c8_35, %c0_36] : memref<10x32x16xf32, #tpu.memory_space<vmem>>, vector<8x16x16xf32>
    %c4 = arith.constant 4 : index
    %c0_37 = arith.constant 0 : index
    %52 = vector.load %arg5[%c4, %c0_37] : memref<9x16xf32, #tpu.memory_space<vmem>>, vector<1x16xf32>
    %53 = vector.shape_cast %52 : vector<1x16xf32> to vector<1x1x16xf32>
    %54 = vector.broadcast %53 : vector<1x1x16xf32> to vector<8x16x16xf32>
    %55 = arith.mulf %51, %54 : vector<8x16x16xf32>
    %56 = arith.addf %50, %55 : vector<8x16x16xf32>
    %c1_38 = arith.constant 1 : index
    %c9_39 = arith.constant 9 : index
    %c0_40 = arith.constant 0 : index
    %57 = vector.load %arg10[%c1_38, %c9_39, %c0_40] : memref<10x32x16xf32, #tpu.memory_space<vmem>>, vector<8x16x16xf32>
    %c5 = arith.constant 5 : index
    %c0_41 = arith.constant 0 : index
    %58 = vector.load %arg5[%c5, %c0_41] : memref<9x16xf32, #tpu.memory_space<vmem>>, vector<1x16xf32>
    %59 = vector.shape_cast %58 : vector<1x16xf32> to vector<1x1x16xf32>
    %60 = vector.broadcast %59 : vector<1x1x16xf32> to vector<8x16x16xf32>
    %61 = arith.mulf %57, %60 : vector<8x16x16xf32>
    %62 = arith.addf %56, %61 : vector<8x16x16xf32>
    %c2_42 = arith.constant 2 : index
    %c7_43 = arith.constant 7 : index
    %c0_44 = arith.constant 0 : index
    %63 = vector.load %arg10[%c2_42, %c7_43, %c0_44] : memref<10x32x16xf32, #tpu.memory_space<vmem>>, vector<8x16x16xf32>
    %c6 = arith.constant 6 : index
    %c0_45 = arith.constant 0 : index
    %64 = vector.load %arg5[%c6, %c0_45] : memref<9x16xf32, #tpu.memory_space<vmem>>, vector<1x16xf32>
    %65 = vector.shape_cast %64 : vector<1x16xf32> to vector<1x1x16xf32>
    %66 = vector.broadcast %65 : vector<1x1x16xf32> to vector<8x16x16xf32>
    %67 = arith.mulf %63, %66 : vector<8x16x16xf32>
    %68 = arith.addf %62, %67 : vector<8x16x16xf32>
    %c2_46 = arith.constant 2 : index
    %c8_47 = arith.constant 8 : index
    %c0_48 = arith.constant 0 : index
    %69 = vector.load %arg10[%c2_46, %c8_47, %c0_48] : memref<10x32x16xf32, #tpu.memory_space<vmem>>, vector<8x16x16xf32>
    %c7_49 = arith.constant 7 : index
    %c0_50 = arith.constant 0 : index
    %70 = vector.load %arg5[%c7_49, %c0_50] : memref<9x16xf32, #tpu.memory_space<vmem>>, vector<1x16xf32>
    %71 = vector.shape_cast %70 : vector<1x16xf32> to vector<1x1x16xf32>
    %72 = vector.broadcast %71 : vector<1x1x16xf32> to vector<8x16x16xf32>
    %73 = arith.mulf %69, %72 : vector<8x16x16xf32>
    %74 = arith.addf %68, %73 : vector<8x16x16xf32>
    %c2_51 = arith.constant 2 : index
    %c9_52 = arith.constant 9 : index
    %c0_53 = arith.constant 0 : index
    %75 = vector.load %arg10[%c2_51, %c9_52, %c0_53] : memref<10x32x16xf32, #tpu.memory_space<vmem>>, vector<8x16x16xf32>
    %c8_54 = arith.constant 8 : index
    %c0_55 = arith.constant 0 : index
    %76 = vector.load %arg5[%c8_54, %c0_55] : memref<9x16xf32, #tpu.memory_space<vmem>>, vector<1x16xf32>
    %77 = vector.shape_cast %76 : vector<1x16xf32> to vector<1x1x16xf32>
    %78 = vector.broadcast %77 : vector<1x1x16xf32> to vector<8x16x16xf32>
    %79 = arith.mulf %75, %78 : vector<8x16x16xf32>
    %80 = arith.addf %74, %79 : vector<8x16x16xf32>
    %c0_56 = arith.constant 0 : index
    %c0_57 = arith.constant 0 : index
    %81 = vector.load %arg6[%c0_56, %c0_57] : memref<1x16xf32, #tpu.memory_space<vmem>>, vector<1x16xf32>
    %82 = vector.shape_cast %81 : vector<1x16xf32> to vector<1x1x16xf32>
    %83 = vector.broadcast %82 : vector<1x1x16xf32> to vector<8x16x16xf32>
    %84 = arith.addf %80, %83 : vector<8x16x16xf32>
    %cst_58 = arith.constant 0.000000e+00 : f32
    %cst_59 = arith.constant 6.000000e+00 : f32
    %85 = vector.broadcast %cst_58 : f32 to vector<8x16x16xf32>
    %86 = arith.maximumf %85, %84 : vector<8x16x16xf32>
    %87 = vector.broadcast %cst_59 : f32 to vector<8x16x16xf32>
    %88 = arith.minimumf %87, %86 : vector<8x16x16xf32>
    %89 = vector.shape_cast %88 : vector<8x16x16xf32> to vector<128x16xf32>
    %90 = arith.truncf %89 : vector<128x16xf32> to vector<128x16xbf16>
    %c0_60 = arith.constant 0 : index
    %c0_61 = arith.constant 0 : index
    %91 = vector.load %arg7[%c0_60, %c0_61] : memref<16x4xbf16, #tpu.memory_space<vmem>>, vector<16x4xbf16>
    %cst_62 = arith.constant dense<0.000000e+00> : vector<128x4xf32>
    %92 = tpu.matmul %90, %91, %cst_62 {dimension_numbers = #tpu.dot_dimension_numbers<[1], [0], [0], [1], [0, 0, 1, 1], [], []>} : vector<128x16xbf16>, vector<16x4xbf16>, vector<128x4xf32> -> vector<128x4xf32>
    %c0_63 = arith.constant 0 : index
    %c0_64 = arith.constant 0 : index
    %93 = vector.load %arg8[%c0_63, %c0_64] : memref<1x4xf32, #tpu.memory_space<vmem>>, vector<1x4xf32>
    %94 = vector.broadcast %93 : vector<1x4xf32> to vector<128x4xf32>
    %95 = arith.addf %92, %94 : vector<128x4xf32>
    %c8_i32_65 = arith.constant 8 : i32
    %96 = arith.muli %arg1, %c8_i32_65 : i32
    %c1_i32_66 = arith.constant 1 : i32
    %97 = arith.addi %96, %c1_i32_66 : i32
    %c16_i32_67 = arith.constant 16 : i32
    %98 = arith.muli %97, %c16_i32_67 : i32
    %99 = tpu.assume_multiple %98, 16 : i32
    %c0_68 = arith.constant 0 : index
    %100 = arith.index_cast %99 : i32 to index
    %c0_69 = arith.constant 0 : index
    %101 = vector.load %arg2[%c0_68, %100, %c0_69] : memref<1x288x4xbf16, #tpu.memory_space<vmem>>, vector<1x128x4xbf16>
    %102 = vector.shape_cast %101 : vector<1x128x4xbf16> to vector<128x4xbf16>
    %103 = arith.extf %102 : vector<128x4xbf16> to vector<128x4xf32>
    %104 = arith.addf %95, %103 : vector<128x4xf32>
    %105 = vector.shape_cast %104 : vector<128x4xf32> to vector<1x128x4xf32>
    %c0_70 = arith.constant 0 : index
    %c0_71 = arith.constant 0 : index
    %c0_72 = arith.constant 0 : index
    %106 = vector.load %arg9[%c0_70, %c0_71, %c0_72] : memref<1x128x4xf32, #tpu.memory_space<vmem>>, vector<1x128x4xf32>
    tpu.vector_store %arg9[%c0_70, %c0_71, %c0_72], %105 {strides = array<i32>} : memref<1x128x4xf32, #tpu.memory_space<vmem>>, vector<1x128x4xf32>,
    return
  }
  func.func @transform_0(%arg0: i32, %arg1: i32) -> (i32, i32, i32) {
    %c0_i32 = arith.constant 0 : i32
    %c0_i32_0 = arith.constant 0 : i32
    %c0_i32_1 = arith.constant 0 : i32
    return %arg0, %c0_i32, %c0_i32_0 : i32, i32, i32
  }
  func.func @transform_1(%arg0: i32, %arg1: i32) -> (i32, i32) {
    %c0_i32 = arith.constant 0 : i32
    %c0_i32_0 = arith.constant 0 : i32
    %c0_i32_1 = arith.constant 0 : i32
    return %c0_i32, %c0_i32_0 : i32, i32
  }
  func.func @transform_2(%arg0: i32, %arg1: i32) -> (i32, i32) {
    %c0_i32 = arith.constant 0 : i32
    %c0_i32_0 = arith.constant 0 : i32
    %c0_i32_1 = arith.constant 0 : i32
    return %c0_i32, %c0_i32_0 : i32, i32
  }
  func.func @transform_3(%arg0: i32, %arg1: i32) -> (i32, i32) {
    %c0_i32 = arith.constant 0 : i32
    %c0_i32_0 = arith.constant 0 : i32
    %c0_i32_1 = arith.constant 0 : i32
    return %c0_i32, %c0_i32_0 : i32, i32
  }
  func.func @transform_4(%arg0: i32, %arg1: i32) -> (i32, i32) {
    %c0_i32 = arith.constant 0 : i32
    %c0_i32_0 = arith.constant 0 : i32
    %c0_i32_1 = arith.constant 0 : i32
    return %c0_i32, %c0_i32_0 : i32, i32
  }
  func.func @transform_5(%arg0: i32, %arg1: i32) -> (i32, i32) {
    %c0_i32 = arith.constant 0 : i32
    %c0_i32_0 = arith.constant 0 : i32
    %c0_i32_1 = arith.constant 0 : i32
    return %c0_i32, %c0_i32_0 : i32, i32
  }
  func.func @transform_6(%arg0: i32, %arg1: i32) -> (i32, i32) {
    %c0_i32 = arith.constant 0 : i32
    %c0_i32_0 = arith.constant 0 : i32
    %c0_i32_1 = arith.constant 0 : i32
    return %c0_i32, %c0_i32_0 : i32, i32
  }
  func.func @transform_7(%arg0: i32, %arg1: i32) -> (i32, i32, i32) {
    %c0_i32 = arith.constant 0 : i32
    %c0_i32_0 = arith.constant 0 : i32
    return %arg0, %arg1, %c0_i32 : i32, i32, i32
  }
}

</mosaic_0001>

<bundles_post_ra>
// kernel: tpu_custom_call.1
= control target key start
LH: loop header
LB: loop body
LE: loop exit
PB: predicated region body
PF: predicated region fallthrough
CT: control target
= control target key end

     0   :  { %s1750_s24 = smov 0   ;;  %s1752_s25 = smov 0   ;;  %s2298_s0 = inlined_call_operand.vmem [shape: bf16[2,288,4], index: 0, kind: input, shape index: {}]   ;;  %s2299_s1 = inlined_call_operand.vmem [shape: bf16[4,16], index: 1, kind: input, shape index: {}]   ;;  %s2300_s2 = inlined_call_operand.vmem [shape: f32[1,16], index: 2, kind: input, shape index: {}]   ;;  %s2301_s3 = inlined_call_operand.vmem [shape: f32[9,16], index: 3, kind: input, shape index: {}]   ;;  %s2302_s4 = inlined_call_operand.vmem [shape: f32[1,16], index: 4, kind: input, shape index: {}]   ;;  %s2303_s5 = inlined_call_operand.vmem [shape: bf16[16,4], index: 5, kind: input, shape index: {}]   ;;  %s2304_s6 = inlined_call_operand.vmem [shape: f32[1,4], index: 6, kind: input, shape index: {}]   ;;  %s2305_s7 = inlined_call_operand.vmem [shape: f32[2,256,4], index: 7, kind: output, shape index: {}]  }
   0x1   :  { %s1754_s26 = smov 0   ;;  %s1756_s27 = smov 0  }
   0x2   :  { %s1758_s28 = smov 0  }
   0x3 LB: > { %s26_s29 = sadd.s32 1, %s1697_s26  ;;  %s29_s30 = sadd.s32 1, %s1701_s27  ;;  %s1705_s28 = sphi %s1758_s28, %s17_s28   ;;  %s1701_s27 = sphi %s1756_s27, %s2309_s27   ;;  %s1697_s26 = sphi %s1754_s26, %s2308_s26   ;;  %s1693_s25 = sphi %s1752_s25, %s2307_s25   ;;  %s1689_s24 = sphi %s1750_s24, %s2306_s24  }
   0x4   : > { %p27_p0 = scmp.ge.s32.totalorder %s26_s29, 2  ;;  %p1454_p1 = scmp.ge.s32.totalorder %s1705_s28, 1 }
   0x5   : > { %p251_p2 = scmp.lt.s32.totalorder %s1705_s28, 5 }
   0x6   : > { %s2311_s29 = smov (%p27_p0, %s26_s29), 0  ;;  %s2313_s30 = smov (!%p27_p0, %s29_s30), %s1701_s27 }
   0x7   : > { %p252_p3 = pnand %p1454_p1, %p251_p2  ;;  %p31_p4 = scmp.ge.s32.totalorder %s2313_s30, 2 }
   0x8   : > { %p287_p5 = scmp.lt.s32.totalorder (!%p252_p3), %s1693_s25, 1  ;;  %s1456_s10 = sshll.u32 (!%p252_p3), %s1689_s24, 4 }
   0x9   : > { %s2315_s30 = smov (%p31_p4, %s2313_s30), 0  ;;  %255 = sbr.rel (%p252_p3) target bundleno = 572 (0x23c), region = 48 }
   0xa   : > { %p295_p6 = scmp.lt.s32.totalorder (!%p252_p3), %s1456_s10, 31  ;;  %s1459_s11 = sshll.u32 (!%p252_p3), %s1689_s24, 7 }
   0xb   : > { %s304_s15 = sshra.s32 (!%p252_p3), %s1459_s11, 3  ;;  %p1482_p7 = scmp.ne.s32.totalorder (!%p252_p3), %s1689_s24, 0 }
   0xc   : > { %s1460_s23 = sshll.u32 (!%p252_p3), %s304_s15, 2 }
   0xe   : > { %v328_v0 = vld [vmem:[%s2299_s1] sm:$0x3]  ;;  %vm417_vm0 = vcmask 1041408   ;;  %s2317_s25 = smov (!%p287_p5, %s1693_s25), 1  ;;  %s2319_s10 = smov (!%p295_p6, %s1456_s10), 31  ;;  %vm386_vm1 = vcmask 31744  }
   0xf   : > { %1611 = vmatprep.subr.msk.bf16.mxu0 %vm417_vm0, %v328_v0  ;;  %v419_v1 = vsel %vm417_vm0, %v328_v0, 0  ;;  %s1612_s12 = smul.u32 144, %s2317_s25  ;;  %s1457_s13 = sshll.u32 %s2317_s25, 5  ;;  %vm595_vm2 = vcmask 122880   ;;  %v1707_v12 = vmov 0.0   ;;  %vm574_vm3 = vcmask 130048  }
  0x10   : > { %1572 = vmatpush3.bf16.msra.mxu0 %v419_v1  ;;  %s298_s14 = sadd.s32 %s1457_s13, %s2319_s10  ;;  %596 = vst.msk [vmem:[#allocation2 + $0x7] sm:$0x1] %vm595_vm2, %v1707_v12  ;;  %597 = vst.msk [vmem:[#allocation2 + $0x27] sm:$0x1] %vm595_vm2, %v1707_v12  ;;  %v1833_v13 = vld [vmem:[%s2300_s2] ss:$0 sm:$0xff] }
  0x11   : > { %s1792_s18 = scalar_lea.vmem %s2298_s0, %s1612_s12  ;;  %s1458_s19 = sshll.u32 %s298_s14, 3  ;;  %598 = vst.msk [vmem:[#allocation2 + $0x47] sm:$0x1] %vm595_vm2, %v1707_v12  ;;  %599 = vst.msk [vmem:[#allocation2 + $0x67] sm:$0x1] %vm595_vm2, %v1707_v12 }
  0x12   : > { %s1797_s22 = scalar_lea.vmem %s2305_s7, %s1458_s19  ;;  %s307_s8 = scalar_lea.vmem %s1792_s18, %s1460_s23  ;;  %600 = vst.msk [vmem:[#allocation2 + $0x87] sm:$0x1] %vm595_vm2, %v1707_v12  ;;  %601 = vst.msk [vmem:[#allocation2 + $0xa7] sm:$0x1] %vm595_vm2, %v1707_v12 }
  0x13   : > { %v1656_v2 = vld [vmem:[%s307_s8] sm:$0xff]   ;;  %v1657_v3 = vld [vmem:[%s307_s8 + $0x8] sm:$0xff]   ;;  %v1658_v4 = vld [vmem:[%s307_s8 + $0x10] sm:$0xff]   ;;  %602 = vst.msk [vmem:[#allocation2 + $0xc7] sm:$0x1] %vm595_vm2, %v1707_v12 }
  0x14   : > { %1573 = vmatprep.mubr.msk.bf16.mxu0 %vm386_vm1, %v1656_v2  ;;  %v1659_v5 = vld [vmem:[%s307_s8 + $0x18] sm:$0xff]   ;;  %v1660_v6 = vld [vmem:[%s307_s8 + $0x20] sm:$0xff]   ;;  %v1661_v7 = vld [vmem:[%s307_s8 + $0x28] sm:$0xff]   ;;  %603 = vst.msk [vmem:[#allocation2 + $0xe7] sm:$0x1] %vm595_vm2, %v1707_v12 }
  0x15   : > { %1574 = vmatmul.mubr.msk.bf16.vlgmr.msra.gmra.mxu0 %vm386_vm1, %v1657_v3  ;;  %v1662_v8 = vld [vmem:[%s307_s8 + $0x30] sm:$0xff]   ;;  %v1663_v9 = vld [vmem:[%s307_s8 + $0x38] sm:$0xff]   ;;  %v1664_v10 = vld [vmem:[%s307_s8 + $0x40] sm:$0xff]   ;;  %604 = vst.msk [vmem:[#allocation2 + $0x107] sm:$0x1] %vm595_vm2, %v1707_v12 }
  0x16   : > { %1577 = vmatprep.mubr.msk.bf16.mxu0 %vm386_vm1, %v1658_v4  ;;  %v1665_v11 = vld [vmem:[%s307_s8 + $0x48] sm:$0xff]   ;;  %605 = vst.msk [vmem:[#allocation2 + $0x127] sm:$0x1] %vm595_vm2, %v1707_v12  ;;  %606 = vst.msk [vmem:[#allocation2 + $0x18] sm:$0x1] %vm595_vm2, %v1707_v12 }
  0x17   : > { %607 = vst.msk [vmem:[#allocation2 + $0x38] sm:$0x1] %vm595_vm2, %v1707_v12  ;;  %608 = vst.msk [vmem:[#allocation2 + $0x58] sm:$0x1] %vm595_vm2, %v1707_v12 }
  0x18   : > { %609 = vst.msk [vmem:[#allocation2 + $0x78] sm:$0x1] %vm595_vm2, %v1707_v12  ;;  %610 = vst.msk [vmem:[#allocation2 + $0x98] sm:$0x1] %vm595_vm2, %v1707_v12 }
  0x19   : > { %611 = vst.msk [vmem:[#allocation2 + $0xb8] sm:$0x1] %vm595_vm2, %v1707_v12  ;;  %612 = vst.msk [vmem:[#allocation2 + $0xd8] sm:$0x1] %vm595_vm2, %v1707_v12 }
  0x1a   : > { %613 = vst.msk [vmem:[#allocation2 + $0xf8] sm:$0x1] %vm595_vm2, %v1707_v12  ;;  %614 = vst.msk [vmem:[#allocation2 + $0x118] sm:$0x1] %vm595_vm2, %v1707_v12 }
  0x1b   : > { %615 = vst.msk [vmem:[#allocation2 + $0x138] sm:$0x1] %vm595_vm2, %v1707_v12 }
  0x1d   : > { %1578 = vmatmul.mubr.msk.bf16.gmra.mxu0 %vm386_vm1, %v1659_v5 }
  0x1e   : > { %1581 = vmatprep.mubr.msk.bf16.mxu0 %vm386_vm1, %v1660_v6 }
  0x25   : > { %1582 = vmatmul.mubr.msk.bf16.gmra.mxu0 %vm386_vm1, %v1661_v7 }
  0x26   : > { %1585 = vmatprep.mubr.msk.bf16.mxu0 %vm386_vm1, %v1662_v8 }
  0x2d   : > { %1586 = vmatmul.mubr.msk.bf16.gmra.mxu0 %vm386_vm1, %v1663_v9 }
  0x2e   : > { %1589 = vmatprep.mubr.msk.bf16.mxu0 %vm386_vm1, %v1664_v10 }
  0x35   : > { %1590 = vmatmul.mubr.msk.bf16.gmra.mxu0 %vm386_vm1, %v1665_v11 }
  0xd5   : > { %v1575_v14 = vpop.f32.mrf.mxu0 }
  0xd6   : > { %v464_v15 = vadd.f32 %v1575_v14, %v1833_v13 }
  0xd7   : > { %v455_v16 = vpop.f32.mrf.mxu0 }
  0xd8   : > { %v536_v17 = vmax.f32 %v464_v15, 0.0  ;;  %v456_v18 = vadd.f32 %v1833_v13, %v455_v16 }
  0xd9   : > { %v1576_v19 = vpop.f32.mrf.mxu0 }
  0xda   : > { %v556_v20 = vmin.f32 %v536_v17, 6.0  ;;  %v534_v21 = vmax.f32 %v456_v18, 0.0  ;;  %v467_v22 = vadd.f32 %v1576_v19, %v1833_v13 }
  0xdb   : > { %v458_v23 = vpop.f32.mrf.mxu0 }
  0xdc   : > { %577 = vst.msk [vmem:[#allocation2 + $0x28] sm:$0xff] %vm574_vm3, %v556_v20  ;;  %v554_v24 = vmin.f32 %v534_v21, 6.0  ;;  %v537_v25 = vmax.f32 %v467_v22, 0.0  ;;  %v459_v26 = vadd.f32 %v1833_v13, %v458_v23 }
  0xdd   : > { %v1579_v27 = vpop.f32.mrf.mxu0 }
  0xde   : > { %575 = vst.msk [vmem:[#allocation2 + $0x8] sm:$0xff] %vm574_vm3, %v554_v24  ;;  %v557_v28 = vmin.f32 %v537_v25, 6.0  ;;  %v535_v29 = vmax.f32 %v459_v26, 0.0  ;;  %v480_v30 = vadd.f32 %v1579_v27, %v1833_v13 }
  0xdf   : > { %v471_v31 = vpop.f32.mrf.mxu0 }
  0xe0   : > { %578 = vst.msk [vmem:[#allocation2 + $0x30] sm:$0xff] %vm574_vm3, %v557_v28  ;;  %v555_v32 = vmin.f32 %v535_v29, 6.0  ;;  %v540_v33 = vmax.f32 %v480_v30, 0.0  ;;  %v472_v34 = vadd.f32 %v1833_v13, %v471_v31 }
  0xe1   : > { %v1580_v35 = vpop.f32.mrf.mxu0 }
  0xe2   : > { %576 = vst.msk [vmem:[#allocation2 + $0x10] sm:$0xff] %vm574_vm3, %v555_v32  ;;  %v560_v36 = vmin.f32 %v540_v33, 6.0  ;;  %v538_v37 = vmax.f32 %v472_v34, 0.0  ;;  %v483_v38 = vadd.f32 %v1580_v35, %v1833_v13 }
  0xe3   : > { %v474_v39 = vpop.f32.mrf.mxu0 }
  0xe4   : > { %581 = vst.msk [vmem:[#allocation2 + $0x68] sm:$0xff] %vm574_vm3, %v560_v36  ;;  %v558_v40 = vmin.f32 %v538_v37, 6.0  ;;  %v541_v41 = vmax.f32 %v483_v38, 0.0  ;;  %v475_v42 = vadd.f32 %v1833_v13, %v474_v39 }
  0xe5   : > { %v1583_v43 = vpop.f32.mrf.mxu0 }
  0xe6   : > { %579 = vst.msk [vmem:[#allocation2 + $0x48] sm:$0xff] %vm574_vm3, %v558_v40  ;;  %v561_v44 = vmin.f32 %v541_v41, 6.0  ;;  %v539_v45 = vmax.f32 %v475_v42, 0.0  ;;  %v496_v46 = vadd.f32 %v1583_v43, %v1833_v13 }
  0xe7   : > { %v487_v47 = vpop.f32.mrf.mxu0 }
  0xe8   : > { %582 = vst.msk [vmem:[#allocation2 + $0x70] sm:$0xff] %vm574_vm3, %v561_v44  ;;  %v559_v48 = vmin.f32 %v539_v45, 6.0  ;;  %v544_v49 = vmax.f32 %v496_v46, 0.0  ;;  %v488_v50 = vadd.f32 %v1833_v13, %v487_v47 }
  0xe9   : > { %v1584_v51 = vpop.f32.mrf.mxu0 }
  0xea   : > { %580 = vst.msk [vmem:[#allocation2 + $0x50] sm:$0xff] %vm574_vm3, %v559_v48  ;;  %v564_v52 = vmin.f32 %v544_v49, 6.0  ;;  %v542_v53 = vmax.f32 %v488_v50, 0.0  ;;  %v499_v54 = vadd.f32 %v1584_v51, %v1833_v13 }
  0xeb   : > { %v490_v55 = vpop.f32.mrf.mxu0 }
  0xec   : > { %585 = vst.msk [vmem:[#allocation2 + $0xa8] sm:$0xff] %vm574_vm3, %v564_v52  ;;  %v562_v56 = vmin.f32 %v542_v53, 6.0  ;;  %v545_v57 = vmax.f32 %v499_v54, 0.0  ;;  %v491_v58 = vadd.f32 %v1833_v13, %v490_v55 }
  0xed   : > { %v1587_v59 = vpop.f32.mrf.mxu0 }
  0xee   : > { %583 = vst.msk [vmem:[#allocation2 + $0x88] sm:$0xff] %vm574_vm3, %v562_v56  ;;  %v565_v60 = vmin.f32 %v545_v57, 6.0  ;;  %v543_v61 = vmax.f32 %v491_v58, 0.0  ;;  %v512_v62 = vadd.f32 %v1587_v59, %v1833_v13 }
  0xef   : > { %v503_v63 = vpop.f32.mrf.mxu0 }
  0xf0   : > { %586 = vst.msk [vmem:[#allocation2 + $0xb0] sm:$0xff] %vm574_vm3, %v565_v60  ;;  %v563_v0 = vmin.f32 %v543_v61, 6.0  ;;  %v548_v1 = vmax.f32 %v512_v62, 0.0  ;;  %v504_v2 = vadd.f32 %v1833_v13, %v503_v63 }
  0xf1   : > { %v1588_v3 = vpop.f32.mrf.mxu0 }
  0xf2   : > { %584 = vst.msk [vmem:[#allocation2 + $0x90] sm:$0xff] %vm574_vm3, %v563_v0  ;;  %v568_v4 = vmin.f32 %v548_v1, 6.0  ;;  %v546_v5 = vmax.f32 %v504_v2, 0.0  ;;  %v515_v6 = vadd.f32 %v1588_v3, %v1833_v13 }
  0xf3   : > { %v506_v7 = vpop.f32.mrf.mxu0 }
  0xf4   : > { %589 = vst.msk [vmem:[#allocation2 + $0xe8] sm:$0xff] %vm574_vm3, %v568_v4  ;;  %v566_v8 = vmin.f32 %v546_v5, 6.0  ;;  %v549_v9 = vmax.f32 %v515_v6, 0.0  ;;  %v507_v10 = vadd.f32 %v1833_v13, %v506_v7 }
  0xf5   : > { %v1591_v11 = vpop.f32.mrf.mxu0 }
  0xf6   : > { %587 = vst.msk [vmem:[#allocation2 + $0xc8] sm:$0xff] %vm574_vm3, %v566_v8  ;;  %v569_v12 = vmin.f32 %v549_v9, 6.0  ;;  %v547_v14 = vmax.f32 %v507_v10, 0.0  ;;  %v528_v15 = vadd.f32 %v1591_v11, %v1833_v13 }
  0xf7   : > { %v519_v16 = vpop.f32.mrf.mxu0 }
  0xf8   : > { %590 = vst.msk [vmem:[#allocation2 + $0xf0] sm:$0xff] %vm574_vm3, %v569_v12  ;;  %v567_v17 = vmin.f32 %v547_v14, 6.0  ;;  %v552_v18 = vmax.f32 %v528_v15, 0.0  ;;  %v520_v19 = vadd.f32 %v1833_v13, %v519_v16 }
  0xf9   : > { %v1592_v20 = vpop.f32.mrf.mxu0 }
  0xfa   : > { %588 = vst.msk [vmem:[#allocation2 + $0xd0] sm:$0xff] %vm574_vm3, %v567_v17  ;;  %v572_v21 = vmin.f32 %v552_v18, 6.0  ;;  %v550_v22 = vmax.f32 %v520_v19, 0.0  ;;  %v531_v23 = vadd.f32 %v1592_v20, %v1833_v13 }
  0xfb   : > { %v522_v24 = vpop.f32.mrf.mxu0 }
  0xfc   : > { %593 = vst.msk [vmem:[#allocation2 + $0x128] sm:$0xff] %vm574_vm3, %v572_v21  ;;  %v570_v25 = vmin.f32 %v550_v22, 6.0  ;;  %v553_v26 = vmax.f32 %v531_v23, 0.0  ;;  %v523_v27 = vadd.f32 %v1833_v13, %v522_v24 }
  0xfe   : > { %591 = vst.msk [vmem:[#allocation2 + $0x108] sm:$0xff] %vm574_vm3, %v570_v25  ;;  %v573_v28 = vmin.f32 %v553_v26, 6.0  ;;  %v551_v29 = vmax.f32 %v523_v27, 0.0  ;;  %619 = sbr.rel (%p1482_p7) target bundleno = 261 (0x105), region = 52 }
 0x100   : > { %594 = vst.msk [vmem:[#allocation2 + $0x130] sm:$0xff] %vm574_vm3, %v573_v28  ;;  %v571_v30 = vmin.f32 %v551_v29, 6.0 }
 0x102   : > { %592 = vst.msk [vmem:[#allocation2 + $0x110] sm:$0xff] %vm574_vm3, %v571_v30 }
 0x103   : > { %v1708_v31 = vmov 0.0  }
 0x104   : > { %620 = vst.msk [vmem:[#allocation2 + $0x8] sm:$0xff] %vm574_vm3, %v1708_v31  ;;  %621 = vst.msk [vmem:[#allocation2 + $0x10] sm:$0xff] %vm574_vm3, %v1708_v31 }
 0x105 PF: > { %p1483_p8 = scmp.ne.s32.totalorder %s1689_s24, 1 }
 0x107   : > { %625 = sbr.rel (%p1483_p8) target bundleno = 270 (0x10e), region = 56 }
 0x10c   : > { %v1709_v13 = vmov 0.0  }
 0x10d   : > { %627 = vst.msk [vmem:[#allocation2 + $0x128] sm:$0xff] %vm574_vm3, %v1709_v13  ;;  %628 = vst.msk [vmem:[#allocation2 + $0x130] sm:$0xff] %vm574_vm3, %v1709_v13 }
 0x10e PF: > { %v1666_v32 = vld [vmem:[%s2303_s5] sm:$0xff]   ;;  %v630_v34 = vld [vmem:[#allocation2 + $0xf] sm:$0xff]  ;;  %v1947_v22 = vld [vmem:[%s2301_s3 + $0x8] ss:$0 sm:$0xff]  ;;  %s1510_s20 = sadd.s32 16, %s1459_s11 }
 0x10f   : > { %v629_v33 = vld [vmem:[#allocation2 + $0x7] sm:$0xff]  ;;  %v1887_v35 = vld [vmem:[%s2301_s3] ss:$0 sm:$0xff]  ;;  %1593 = vmatprep.subr.bf16.mxu1 %v1666_v32  ;;  %v667_v39 = vld [vmem:[#allocation2 + $0x10] sm:$0xff]  ;;  %s1294_s21 = sshra.s32 %s1510_s20, 3 }
 0x110   : > { %v650_v36 = vmul.f32 %v1887_v35, %v629_v33  ;;  %v651_v37 = vmul.f32 %v1887_v35, %v630_v34  ;;  %v666_v38 = vld [vmem:[#allocation2 + $0x8] sm:$0xff]  ;;  %v1894_v40 = vld [vmem:[%s2301_s3 + $0x1] ss:$0 sm:$0xff]  ;;  %1594 = vmatpush3.bf16.msra.mxu1 %v1666_v32  ;;  %v720_v44 = vld [vmem:[#allocation2 + $0x11] sm:$0xff]  ;;  %s1506_s23 = sshll.u32 %s1294_s21, 2 }
 0x111   : > { %v687_v41 = vmul.f32 %v1894_v40, %v666_v38  ;;  %v688_v42 = vmul.f32 %v1894_v40, %v667_v39  ;;  %v719_v43 = vld [vmem:[#allocation2 + $0x9] sm:$0xff]  ;;  %v1901_v45 = vld [vmem:[%s2301_s3 + $0x2] ss:$0 sm:$0xff]  ;;  %v1908_v50 = vld [vmem:[%s2301_s3 + $0x3] ss:$0 sm:$0xff]  ;;  %s2220_s8 = scalar_lea.vmem %s1792_s18, %s1506_s23 }
 0x112   : > { %v740_v46 = vmul.f32 %v1901_v45, %v719_v43  ;;  %v741_v47 = vmul.f32 %v1901_v45, %v720_v44  ;;  %v773_v48 = vld [vmem:[#allocation2 + $0x27] sm:$0xff]  ;;  %v774_v49 = vld [vmem:[#allocation2 + $0x2f] sm:$0xff]  ;;  %v1915_v57 = vld [vmem:[%s2301_s3 + $0x4] ss:$0 sm:$0xff] }
 0x113   : > { %v703_v51 = vadd.f32 %v687_v41, %v650_v36  ;;  %v704_v52 = vadd.f32 %v688_v42, %v651_v37  ;;  %v794_v53 = vmul.f32 %v1908_v50, %v773_v48  ;;  %v795_v54 = vmul.f32 %v1908_v50, %v774_v49  ;;  %v826_v55 = vld [vmem:[#allocation2 + $0x28] sm:$0xff]  ;;  %v827_v56 = vld [vmem:[#allocation2 + $0x30] sm:$0xff]  ;;  %v1922_v62 = vld [vmem:[%s2301_s3 + $0x5] ss:$0 sm:$0xff] }
 0x114   : > { %v847_v58 = vmul.f32 %v1915_v57, %v826_v55  ;;  %v848_v59 = vmul.f32 %v1915_v57, %v827_v56  ;;  %v879_v60 = vld [vmem:[#allocation2 + $0x29] sm:$0xff]  ;;  %v880_v61 = vld [vmem:[#allocation2 + $0x31] sm:$0xff]  ;;  %v652_v63 = vmul.f32 %v1887_v35, %v773_v48  ;;  %v653_v0 = vmul.f32 %v1887_v35, %v774_v49  ;;  %v1931_v7 = vld [vmem:[%s2301_s3 + $0x6] ss:$0 sm:$0xff] }
 0x115   : > { %v756_v1 = vadd.f32 %v740_v46, %v703_v51  ;;  %v757_v2 = vadd.f32 %v741_v47, %v704_v52  ;;  %v900_v3 = vmul.f32 %v1922_v62, %v879_v60  ;;  %v901_v4 = vmul.f32 %v1922_v62, %v880_v61  ;;  %v933_v5 = vld [vmem:[#allocation2 + $0x47] sm:$0xff]  ;;  %v934_v6 = vld [vmem:[#allocation2 + $0x4f] sm:$0xff] }
 0x116   : > { %v954_v8 = vmul.f32 %v1931_v7, %v933_v5  ;;  %v955_v9 = vmul.f32 %v1931_v7, %v934_v6  ;;  %v986_v10 = vld [vmem:[#allocation2 + $0x48] sm:$0xff]  ;;  %v987_v11 = vld [vmem:[#allocation2 + $0x50] sm:$0xff]  ;;  %v1938_v12 = vld [vmem:[%s2301_s3 + $0x7] ss:$0 sm:$0xff]  ;;  %v689_v14 = vmul.f32 %v1894_v40, %v826_v55  ;;  %v690_v15 = vmul.f32 %v1894_v40, %v827_v56 }
 0x117   : > { %v810_v16 = vadd.f32 %v794_v53, %v756_v1  ;;  %v811_v17 = vadd.f32 %v795_v54, %v757_v2  ;;  %v1007_v18 = vmul.f32 %v1938_v12, %v986_v10  ;;  %v1008_v19 = vmul.f32 %v1938_v12, %v987_v11  ;;  %v1039_v20 = vld [vmem:[#allocation2 + $0x49] sm:$0xff]  ;;  %v1040_v21 = vld [vmem:[#allocation2 + $0x51] sm:$0xff]  ;;  %v1986_v2 = vld [vmem:[%s2302_s4] ss:$0 sm:$0xff] }
 0x118   : > { %v1060_v23 = vmul.f32 %v1947_v22, %v1039_v20  ;;  %v1061_v24 = vmul.f32 %v1947_v22, %v1040_v21  ;;  %v705_v25 = vadd.f32 %v689_v14, %v652_v63  ;;  %v706_v26 = vadd.f32 %v690_v15, %v653_v0  ;;  %v1957_v39 = vld [vmem:[#allocation2 + $0x67] sm:$0xff]  ;;  %v1959_v41 = vld [vmem:[#allocation2 + $0x6f] sm:$0xff] }
 0x119   : > { %v863_v27 = vadd.f32 %v847_v58, %v810_v16  ;;  %v864_v28 = vadd.f32 %v848_v59, %v811_v17  ;;  %v742_v29 = vmul.f32 %v1901_v45, %v879_v60  ;;  %v743_v30 = vmul.f32 %v1901_v45, %v880_v61  ;;  %v1967_v47 = vld [vmem:[#allocation2 + $0x68] sm:$0xff]  ;;  %v1969_v53 = vld [vmem:[#allocation2 + $0x70] sm:$0xff] }
 0x11a   : > { %v796_v31 = vmul.f32 %v1908_v50, %v933_v5  ;;  %v797_v13 = vmul.f32 %v1908_v50, %v934_v6  ;;  %v849_v32 = vmul.f32 %v1915_v57, %v986_v10  ;;  %v850_v33 = vmul.f32 %v1915_v57, %v987_v11  ;;  %v1971_v54 = vld [vmem:[#allocation2 + $0x69] sm:$0xff]  ;;  %v1973_v55 = vld [vmem:[#allocation2 + $0x71] sm:$0xff] }
 0x11b   : > { %v916_v34 = vadd.f32 %v900_v3, %v863_v27  ;;  %v917_v36 = vadd.f32 %v901_v4, %v864_v28  ;;  %v758_v37 = vadd.f32 %v742_v29, %v705_v25  ;;  %v759_v38 = vadd.f32 %v743_v30, %v706_v26 }
 0x11c   : > { %v902_v42 = vmul.f32 %v1922_v62, %v1039_v20  ;;  %v903_v43 = vmul.f32 %v1922_v62, %v1040_v21  ;;  %v956_v44 = vmul.f32 %v1931_v7, %v1957_v39  ;;  %v957_v46 = vmul.f32 %v1931_v7, %v1959_v41 }
 0x11d   : > { %v970_v48 = vadd.f32 %v954_v8, %v916_v34  ;;  %v971_v49 = vadd.f32 %v955_v9, %v917_v36  ;;  %v812_v51 = vadd.f32 %v796_v31, %v758_v37  ;;  %v813_v52 = vadd.f32 %v797_v13, %v759_v38 }
 0x11e   : > { %v1009_v56 = vmul.f32 %v1938_v12, %v1967_v47  ;;  %v1010_v58 = vmul.f32 %v1938_v12, %v1969_v53  ;;  %v1062_v59 = vmul.f32 %v1947_v22, %v1971_v54  ;;  %v1063_v60 = vmul.f32 %v1947_v22, %v1973_v55 }
 0x11f   : > { %v1023_v61 = vadd.f32 %v1007_v18, %v970_v48  ;;  %v1024_v63 = vadd.f32 %v1008_v19, %v971_v49  ;;  %v865_v0 = vadd.f32 %v849_v32, %v812_v51  ;;  %v866_v1 = vadd.f32 %v850_v33, %v813_v52  ;;  %v2008_v48 = vld [vmem:[#allocation2 + $0x87] sm:$0xff] }
 0x120   : > { %v654_v3 = vmul.f32 %v1887_v35, %v933_v5  ;;  %v655_v4 = vmul.f32 %v1887_v35, %v934_v6  ;;  %v691_v8 = vmul.f32 %v1894_v40, %v986_v10  ;;  %v692_v9 = vmul.f32 %v1894_v40, %v987_v11 }
 0x121   : > { %v1076_v14 = vadd.f32 %v1060_v23, %v1023_v61  ;;  %v1077_v15 = vadd.f32 %v1061_v24, %v1024_v63  ;;  %v918_v16 = vadd.f32 %v902_v42, %v865_v0  ;;  %v919_v17 = vadd.f32 %v903_v43, %v866_v1  ;;  %v991_v0 = vld [vmem:[#allocation2 + $0x90] sm:$0xff] }
 0x122   : > { %v707_v18 = vadd.f32 %v691_v8, %v654_v3  ;;  %v708_v19 = vadd.f32 %v692_v9, %v655_v4  ;;  %v744_v25 = vmul.f32 %v1901_v45, %v1039_v20  ;;  %v745_v26 = vmul.f32 %v1901_v45, %v1040_v21  ;;  %v1043_v3 = vld [vmem:[#allocation2 + $0x89] sm:$0xff] }
 0x123   : > { %v1099_v27 = vadd.f32 %v1986_v2, %v1076_v14  ;;  %v1100_v5 = vadd.f32 %v1986_v2, %v1077_v15  ;;  %v972_v28 = vadd.f32 %v956_v44, %v918_v16  ;;  %v973_v6 = vadd.f32 %v957_v46, %v919_v17  ;;  %v1044_v14 = vld [vmem:[#allocation2 + $0x91] sm:$0xff] }
 0x124   : > { %v760_v29 = vadd.f32 %v744_v25, %v707_v18  ;;  %v761_v10 = vadd.f32 %v745_v26, %v708_v19  ;;  %v798_v11 = vmul.f32 %v1908_v50, %v1957_v39  ;;  %v799_v23 = vmul.f32 %v1908_v50, %v1959_v41 }
 0x125   : > { %v1115_v24 = vmax.f32 %v1099_v27, 0.0  ;;  %v1116_v30 = vmax.f32 %v1100_v5, 0.0  ;;  %v1025_v31 = vadd.f32 %v1009_v56, %v972_v28  ;;  %v1026_v20 = vadd.f32 %v1010_v58, %v973_v6  ;;  %v2012_v56 = vld [vmem:[#allocation2 + $0x8f] sm:$0xff] }
 0x126   : > { %v814_v13 = vadd.f32 %v798_v11, %v760_v29  ;;  %v815_v21 = vadd.f32 %v799_v23, %v761_v10  ;;  %v851_v32 = vmul.f32 %v1915_v57, %v1967_v47  ;;  %v852_v33 = vmul.f32 %v1915_v57, %v1969_v53 }
 0x127   : > { %v1131_v34 = vmin.f32 %v1115_v24, 6.0  ;;  %v1132_v36 = vmin.f32 %v1116_v30, 6.0  ;;  %v1078_v37 = vadd.f32 %v1062_v59, %v1025_v31  ;;  %v1079_v38 = vadd.f32 %v1063_v60, %v1026_v20  ;;  %v2016_v59 = vld [vmem:[#allocation2 + $0x88] sm:$0xff] }
 0x128   : > { %v867_v42 = vadd.f32 %v851_v32, %v814_v13  ;;  %v868_v43 = vadd.f32 %v852_v33, %v815_v21  ;;  %v904_v44 = vmul.f32 %v1922_v62, %v1971_v54  ;;  %v905_v46 = vmul.f32 %v1922_v62, %v1973_v55 }
 0x129   : > { %v1147_v49 = vpack.c.bf16 %v1132_v36, %v1131_v34  ;;  %v1101_v51 = vadd.f32 %v1986_v2, %v1078_v37  ;;  %v1102_v52 = vadd.f32 %v1986_v2, %v1079_v38  ;;  %v958_v58 = vmul.f32 %v1931_v7, %v2008_v48  ;;  %v939_v34 = vld [vmem:[#allocation2 + $0xa7] sm:$0xff]  ;;  %v2050_v36 = vld [vmem:[#allocation2 + $0xaf] sm:$0xff] }
 0x12a   : > { %v920_v60 = vadd.f32 %v904_v44, %v867_v42  ;;  %v921_v61 = vadd.f32 %v905_v46, %v868_v43  ;;  %v959_v63 = vmul.f32 %v1931_v7, %v2012_v56  ;;  %v1011_v1 = vmul.f32 %v1938_v12, %v2016_v59  ;;  %v2052_v37 = vld [vmem:[#allocation2 + $0xa8] sm:$0xff]  ;;  %v993_v44 = vld [vmem:[#allocation2 + $0xb0] sm:$0xff] }
 0x12b   : > { %1595 = vmatprep.mubr.msk.bf16.mxu1 %vm574_vm3, %v1147_v49  ;;  %v1117_v4 = vmax.f32 %v1101_v51, 0.0  ;;  %v1118_v8 = vmax.f32 %v1102_v52, 0.0  ;;  %v1012_v9 = vmul.f32 %v1938_v12, %v991_v0  ;;  %v1064_v15 = vmul.f32 %v1947_v22, %v1043_v3 }
 0x12c   : > { %v974_v16 = vadd.f32 %v958_v58, %v920_v60  ;;  %v975_v17 = vadd.f32 %v959_v63, %v921_v61  ;;  %v1065_v18 = vmul.f32 %v1947_v22, %v1044_v14  ;;  %v656_v19 = vmul.f32 %v1887_v35, %v1957_v39  ;;  %v1045_v60 = vld [vmem:[#allocation2 + $0xa9] sm:$0xff]  ;;  %v1046_v61 = vld [vmem:[#allocation2 + $0xb1] sm:$0xff] }
 0x12d   : > { %v1133_v25 = vmin.f32 %v1117_v4, 6.0  ;;  %v1134_v26 = vmin.f32 %v1118_v8, 6.0  ;;  %v657_v27 = vmul.f32 %v1887_v35, %v1959_v41  ;;  %v693_v5 = vmul.f32 %v1894_v40, %v1967_v47 }
 0x12e   : > { %v1027_v28 = vadd.f32 %v1011_v1, %v974_v16  ;;  %v1028_v6 = vadd.f32 %v1012_v9, %v975_v17  ;;  %v694_v29 = vmul.f32 %v1894_v40, %v1969_v53  ;;  %v746_v10 = vmul.f32 %v1901_v45, %v1971_v54 }
 0x12f   : > { %v1148_v11 = vpack.c.bf16 %v1134_v26, %v1133_v25  ;;  %v709_v23 = vadd.f32 %v693_v5, %v656_v19  ;;  %v747_v39 = vmul.f32 %v1901_v45, %v1973_v55  ;;  %v800_v24 = vmul.f32 %v1908_v50, %v2008_v48 }
 0x130   : > { %v1080_v41 = vadd.f32 %v1064_v15, %v1027_v28  ;;  %v1081_v30 = vadd.f32 %v1065_v18, %v1028_v6  ;;  %v710_v31 = vadd.f32 %v694_v29, %v657_v27  ;;  %v801_v47 = vmul.f32 %v1908_v50, %v2012_v56 }
 0x131   : > { %1596 = vmatmul.mubr.msk.bf16.vlgmr.msra.gmra.mxu1 %vm574_vm3, %v1148_v11  ;;  %v762_v53 = vadd.f32 %v746_v10, %v709_v23  ;;  %v853_v54 = vmul.f32 %v1915_v57, %v2016_v59  ;;  %v854_v20 = vmul.f32 %v1915_v57, %v991_v0  ;;  %v906_v13 = vmul.f32 %v1922_v62, %v1043_v3 }
 0x132   : > { %v1103_v55 = vadd.f32 %v1986_v2, %v1080_v41  ;;  %v1104_v21 = vadd.f32 %v1986_v2, %v1081_v30  ;;  %v763_v32 = vadd.f32 %v747_v39, %v710_v31  ;;  %v907_v33 = vmul.f32 %v1922_v62, %v1044_v14  ;;  %v2080_v41 = vld [vmem:[#allocation2 + $0xc7] sm:$0xff]  ;;  %v2082_v30 = vld [vmem:[#allocation2 + $0xcf] sm:$0xff] }
 0x133   : > { %v816_v38 = vadd.f32 %v800_v24, %v762_v53  ;;  %v960_v42 = vmul.f32 %v1931_v7, %v939_v34  ;;  %v961_v43 = vmul.f32 %v1931_v7, %v2050_v36  ;;  %v1013_v46 = vmul.f32 %v1938_v12, %v2052_v37  ;;  %v2084_v31 = vld [vmem:[#allocation2 + $0xc8] sm:$0xff] }
 0x134   : > { %v1119_v49 = vmax.f32 %v1103_v55, 0.0  ;;  %v1120_v51 = vmax.f32 %v1104_v21, 0.0  ;;  %v817_v52 = vadd.f32 %v801_v47, %v763_v32  ;;  %v1014_v58 = vmul.f32 %v1938_v12, %v993_v44 }
 0x135   : > { %v869_v63 = vadd.f32 %v853_v54, %v816_v38  ;;  %v1066_v1 = vmul.f32 %v1947_v22, %v1045_v60  ;;  %v1067_v4 = vmul.f32 %v1947_v22, %v1046_v61  ;;  %v658_v8 = vmul.f32 %v1887_v35, %v2008_v48  ;;  %v2096_v38 = vld [vmem:[#allocation2 + $0xc9] sm:$0xff] }
 0x136   : > { %v1135_v9 = vmin.f32 %v1119_v49, 6.0  ;;  %v1136_v15 = vmin.f32 %v1120_v51, 6.0  ;;  %v870_v16 = vadd.f32 %v854_v20, %v817_v52  ;;  %v659_v17 = vmul.f32 %v1887_v35, %v2012_v56  ;;  %v2090_v20 = vld [vmem:[#allocation2 + $0xd0] sm:$0xff] }
 0x137   : > { %v922_v18 = vadd.f32 %v906_v13, %v869_v63  ;;  %v695_v19 = vmul.f32 %v1894_v40, %v2016_v59  ;;  %v696_v25 = vmul.f32 %v1894_v40, %v991_v0  ;;  %v748_v26 = vmul.f32 %v1901_v45, %v1043_v3 }
 0x138   : > { %v1149_v27 = vpack.c.bf16 %v1136_v15, %v1135_v9  ;;  %v923_v5 = vadd.f32 %v907_v33, %v870_v16  ;;  %v749_v28 = vmul.f32 %v1901_v45, %v1044_v14  ;;  %v802_v48 = vmul.f32 %v1908_v50, %v939_v34 }
 0x139   : > { %v976_v6 = vadd.f32 %v960_v42, %v922_v18  ;;  %v711_v29 = vadd.f32 %v695_v19, %v658_v8  ;;  %v712_v10 = vadd.f32 %v696_v25, %v659_v17  ;;  %v803_v56 = vmul.f32 %v1908_v50, %v2050_v36  ;;  %v2098_v42 = vld [vmem:[#allocation2 + $0xd1] sm:$0xff] }
 0x13a   : > { %1599 = vmatprep.mubr.msk.bf16.mxu1 %vm574_vm3, %v1149_v27  ;;  %v977_v11 = vadd.f32 %v961_v43, %v923_v5  ;;  %v855_v59 = vmul.f32 %v1915_v57, %v2052_v37  ;;  %v856_v0 = vmul.f32 %v1915_v57, %v993_v44  ;;  %v908_v3 = vmul.f32 %v1922_v62, %v1045_v60 }
 0x13b   : > { %v1029_v23 = vadd.f32 %v1013_v46, %v976_v6  ;;  %v764_v14 = vadd.f32 %v748_v26, %v711_v29  ;;  %v765_v39 = vadd.f32 %v749_v28, %v712_v10  ;;  %v909_v24 = vmul.f32 %v1922_v62, %v1046_v61 }
 0x13c   : > { %v1030_v47 = vadd.f32 %v1014_v58, %v977_v11  ;;  %v962_v53 = vmul.f32 %v1931_v7, %v2080_v41  ;;  %v963_v54 = vmul.f32 %v1931_v7, %v2082_v30  ;;  %v1015_v13 = vmul.f32 %v1938_v12, %v2084_v31 }
 0x13d   : > { %v1082_v55 = vadd.f32 %v1066_v1, %v1029_v23  ;;  %v818_v21 = vadd.f32 %v802_v48, %v764_v14  ;;  %v819_v32 = vadd.f32 %v803_v56, %v765_v39  ;;  %v1016_v33 = vmul.f32 %v1938_v12, %v2090_v20  ;;  %v2126_v23 = vld [vmem:[#allocation2 + $0xe7] sm:$0xff]  ;;  %v2128_v14 = vld [vmem:[#allocation2 + $0xef] sm:$0xff] }
 0x13e   : > { %v1083_v43 = vadd.f32 %v1067_v4, %v1030_v47  ;;  %v1068_v46 = vmul.f32 %v1947_v22, %v2096_v38  ;;  %v1069_v49 = vmul.f32 %v1947_v22, %v2098_v42  ;;  %v660_v51 = vmul.f32 %v1887_v35, %v939_v34 }
 0x13f   : > { %v1105_v52 = vadd.f32 %v1986_v2, %v1082_v55  ;;  %v871_v58 = vadd.f32 %v855_v59, %v818_v21  ;;  %v872_v63 = vadd.f32 %v856_v0, %v819_v32  ;;  %v661_v1 = vmul.f32 %v1887_v35, %v2050_v36 }
 0x140   : > { %v1106_v8 = vadd.f32 %v1986_v2, %v1083_v43  ;;  %v697_v4 = vmul.f32 %v1894_v40, %v2052_v37  ;;  %v698_v9 = vmul.f32 %v1894_v40, %v993_v44  ;;  %v750_v15 = vmul.f32 %v1901_v45, %v1045_v60  ;;  %v2143_v43 = vld [vmem:[#allocation2 + $0xe9] sm:$0xff] }
 0x141   : > { %v1121_v16 = vmax.f32 %v1105_v52, 0.0  ;;  %v924_v17 = vadd.f32 %v908_v3, %v871_v58  ;;  %v925_v18 = vadd.f32 %v909_v24, %v872_v63  ;;  %v751_v34 = vmul.f32 %v1901_v45, %v1046_v61 }
 0x142   : > { %v1122_v19 = vmax.f32 %v1106_v8, 0.0  ;;  %v713_v25 = vadd.f32 %v697_v4, %v660_v51  ;;  %v714_v26 = vadd.f32 %v698_v9, %v661_v1  ;;  %v804_v36 = vmul.f32 %v1908_v50, %v2080_v41 }
 0x143   : > { %v1137_v27 = vmin.f32 %v1121_v16, 6.0  ;;  %v978_v5 = vadd.f32 %v962_v53, %v924_v17  ;;  %v979_v28 = vadd.f32 %v963_v54, %v925_v18  ;;  %v805_v37 = vmul.f32 %v1908_v50, %v2082_v30  ;;  %v2134_v54 = vld [vmem:[#allocation2 + $0xe8] sm:$0xff] }
 0x144   : > { %v1138_v44 = vmin.f32 %v1122_v19, 6.0  ;;  %v766_v48 = vadd.f32 %v750_v15, %v713_v25  ;;  %v767_v60 = vadd.f32 %v751_v34, %v714_v26  ;;  %v857_v6 = vmul.f32 %v1915_v57, %v2084_v31 }
 0x145   : > { %v1031_v29 = vadd.f32 %v1015_v13, %v978_v5  ;;  %v1032_v61 = vadd.f32 %v1016_v33, %v979_v28  ;;  %v858_v10 = vmul.f32 %v1915_v57, %v2090_v20  ;;  %v910_v56 = vmul.f32 %v1922_v62, %v2096_v38  ;;  %v2136_v13 = vld [vmem:[#allocation2 + $0xf0] sm:$0xff] }
 0x146   : > { %v1150_v11 = vpack.c.bf16 %v1138_v44, %v1137_v27  ;;  %v820_v59 = vadd.f32 %v804_v36, %v766_v48  ;;  %v821_v0 = vadd.f32 %v805_v37, %v767_v60  ;;  %v911_v3 = vmul.f32 %v1922_v62, %v2098_v42 }
 0x147   : > { %v1084_v39 = vadd.f32 %v1068_v46, %v1031_v29  ;;  %v1085_v24 = vadd.f32 %v1069_v49, %v1032_v61  ;;  %v964_v47 = vmul.f32 %v1931_v7, %v2126_v23  ;;  %v965_v53 = vmul.f32 %v1931_v7, %v2128_v14  ;;  %v2145_v46 = vld [vmem:[#allocation2 + $0xf1] sm:$0xff]  ;;  %v945_v29 = vld [vmem:[#allocation2 + $0x107] sm:$0xff] }
 0x148   : > { %1600 = vmatmul.mubr.msk.bf16.gmra.mxu1 %vm574_vm3, %v1150_v11  ;;  %v873_v55 = vadd.f32 %v857_v6, %v820_v59  ;;  %v874_v21 = vadd.f32 %v858_v10, %v821_v0  ;;  %v1017_v32 = vmul.f32 %v1938_v12, %v2134_v54  ;;  %v1018_v33 = vmul.f32 %v1938_v12, %v2136_v13  ;;  %v946_v11 = vld [vmem:[#allocation2 + $0x10f] sm:$0xff] }
 0x149   : > { %v1107_v49 = vadd.f32 %v1986_v2, %v1084_v39  ;;  %v1108_v51 = vadd.f32 %v1986_v2, %v1085_v24  ;;  %v1070_v52 = vmul.f32 %v1947_v22, %v2143_v43  ;;  %v1071_v58 = vmul.f32 %v1947_v22, %v2145_v46  ;;  %v998_v0 = vld [vmem:[#allocation2 + $0x108] sm:$0xff] }
 0x14a   : > { %v926_v63 = vadd.f32 %v910_v56, %v873_v55  ;;  %v927_v1 = vadd.f32 %v911_v3, %v874_v21  ;;  %v662_v8 = vmul.f32 %v1887_v35, %v2080_v41  ;;  %v663_v4 = vmul.f32 %v1887_v35, %v2082_v30  ;;  %v1051_v55 = vld [vmem:[#allocation2 + $0x109] sm:$0xff] }
 0x14b   : > { %v1123_v9 = vmax.f32 %v1107_v49, 0.0  ;;  %v1124_v15 = vmax.f32 %v1108_v51, 0.0  ;;  %v699_v16 = vmul.f32 %v1894_v40, %v2084_v31  ;;  %v700_v17 = vmul.f32 %v1894_v40, %v2090_v20  ;;  %v1052_v49 = vld [vmem:[#allocation2 + $0x111] sm:$0xff] }
 0x14c   : > { %v980_v18 = vadd.f32 %v964_v47, %v926_v63  ;;  %v981_v34 = vadd.f32 %v965_v53, %v927_v1  ;;  %v752_v19 = vmul.f32 %v1901_v45, %v2096_v38  ;;  %v753_v25 = vmul.f32 %v1901_v45, %v2098_v42  ;;  %v999_v47 = vld [vmem:[#allocation2 + $0x110] sm:$0xff] }
 0x14d   : > { %v1139_v41 = vmin.f32 %v1123_v9, 6.0  ;;  %v1140_v26 = vmin.f32 %v1124_v15, 6.0  ;;  %v715_v36 = vadd.f32 %v699_v16, %v662_v8  ;;  %v716_v30 = vadd.f32 %v700_v17, %v663_v4 }
 0x14e   : > { %v1033_v27 = vadd.f32 %v1017_v32, %v980_v18  ;;  %v1034_v5 = vadd.f32 %v1018_v33, %v981_v34  ;;  %v806_v31 = vmul.f32 %v1908_v50, %v2126_v23  ;;  %v807_v20 = vmul.f32 %v1908_v50, %v2128_v14 }
 0x14f   : > { %v1151_v28 = vpack.c.bf16 %v1140_v26, %v1139_v41  ;;  %v768_v37 = vadd.f32 %v752_v19, %v715_v36  ;;  %v769_v44 = vadd.f32 %v753_v25, %v716_v30  ;;  %v859_v38 = vmul.f32 %v1915_v57, %v2134_v54 }
 0x150   : > { %v1086_v48 = vadd.f32 %v1070_v52, %v1033_v27  ;;  %v1087_v42 = vadd.f32 %v1071_v58, %v1034_v5  ;;  %v860_v60 = vmul.f32 %v1915_v57, %v2136_v13  ;;  %v912_v6 = vmul.f32 %v1922_v62, %v2143_v43  ;;  %v947_v5 = vld [vmem:[#allocation2 + $0x127] sm:$0xff] }
 0x151   : > { %1603 = vmatprep.mubr.msk.bf16.mxu1 %vm574_vm3, %v1151_v28  ;;  %v822_v61 = vadd.f32 %v806_v31, %v768_v37  ;;  %v823_v10 = vadd.f32 %v807_v20, %v769_v44  ;;  %v913_v56 = vmul.f32 %v1922_v62, %v2145_v46  ;;  %v966_v59 = vmul.f32 %v1931_v7, %v945_v29  ;;  %v948_v28 = vld [vmem:[#allocation2 + $0x12f] sm:$0xff] }
 0x152   : > { %v1109_v3 = vadd.f32 %v1986_v2, %v1086_v48  ;;  %v1110_v39 = vadd.f32 %v1986_v2, %v1087_v42  ;;  %v967_v24 = vmul.f32 %v1931_v7, %v946_v11  ;;  %v1019_v53 = vmul.f32 %v1938_v12, %v998_v0  ;;  %v1000_v44 = vld [vmem:[#allocation2 + $0x128] sm:$0xff] }
 0x153   : > { %v875_v21 = vadd.f32 %v859_v38, %v822_v61  ;;  %v876_v32 = vadd.f32 %v860_v60, %v823_v10  ;;  %v1020_v33 = vmul.f32 %v1938_v12, %v999_v47  ;;  %v1072_v51 = vmul.f32 %v1947_v22, %v1051_v55  ;;  %v1053_v61 = vld [vmem:[#allocation2 + $0x129] sm:$0xff] }
 0x154   : > { %v1125_v52 = vmax.f32 %v1109_v3, 0.0  ;;  %v1126_v58 = vmax.f32 %v1110_v39, 0.0  ;;  %v1073_v63 = vmul.f32 %v1947_v22, %v1052_v49  ;;  %v664_v1 = vmul.f32 %v1887_v35, %v2126_v23 }
 0x155   : > { %v928_v8 = vadd.f32 %v912_v6, %v875_v21  ;;  %v929_v4 = vadd.f32 %v913_v56, %v876_v32  ;;  %v665_v9 = vmul.f32 %v1887_v35, %v2128_v14  ;;  %v701_v15 = vmul.f32 %v1894_v40, %v2134_v54  ;;  %v1001_v6 = vld [vmem:[#allocation2 + $0x130] sm:$0xff] }
 0x156   : > { %v1141_v16 = vmin.f32 %v1125_v52, 6.0  ;;  %v1142_v17 = vmin.f32 %v1126_v58, 6.0  ;;  %v702_v18 = vmul.f32 %v1894_v40, %v2136_v13  ;;  %v754_v34 = vmul.f32 %v1901_v45, %v2143_v43 }
 0x157   : > { %v982_v19 = vadd.f32 %v966_v59, %v928_v8  ;;  %v983_v25 = vadd.f32 %v967_v24, %v929_v4  ;;  %v717_v41 = vadd.f32 %v701_v15, %v664_v1  ;;  %v755_v23 = vmul.f32 %v1901_v45, %v2145_v46 }
 0x158   : > { %v1152_v26 = vpack.c.bf16 %v1142_v17, %v1141_v16  ;;  %v718_v36 = vadd.f32 %v702_v18, %v665_v9  ;;  %v808_v35 = vmul.f32 %v1908_v50, %v945_v29  ;;  %v809_v14 = vmul.f32 %v1908_v50, %v946_v11  ;;  %v1512_v9 = vld [vmem:[%s2220_s8] sm:$0xff]  }
 0x159   : > { %v1035_v54 = vadd.f32 %v1019_v53, %v982_v19  ;;  %v1036_v30 = vadd.f32 %v1020_v33, %v983_v25  ;;  %v770_v27 = vadd.f32 %v754_v34, %v717_v41  ;;  %v861_v40 = vmul.f32 %v1915_v57, %v998_v0  ;;  %v1054_v0 = vld [vmem:[#allocation2 + $0x131] sm:$0xff] }
 0x15a   : > { %1604 = vmatmul.mubr.msk.bf16.gmra.mxu1 %vm574_vm3, %v1152_v26  ;;  %v771_v13 = vadd.f32 %v755_v23, %v718_v36  ;;  %v862_v43 = vmul.f32 %v1915_v57, %v999_v47  ;;  %v914_v46 = vmul.f32 %v1922_v62, %v1051_v55  ;;  %v915_v50 = vmul.f32 %v1922_v62, %v1052_v49 }
 0x15b   : > { %v1088_v31 = vadd.f32 %v1072_v51, %v1035_v54  ;;  %v1089_v20 = vadd.f32 %v1073_v63, %v1036_v30  ;;  %v824_v45 = vadd.f32 %v808_v35, %v770_v27  ;;  %v968_v60 = vmul.f32 %v1931_v7, %v947_v5 }
 0x15c   : > { %v825_v37 = vadd.f32 %v809_v14, %v771_v13  ;;  %v969_v29 = vmul.f32 %v1931_v7, %v948_v28  ;;  %v1021_v59 = vmul.f32 %v1938_v12, %v1000_v44  ;;  %v1022_v3 = vmul.f32 %v1938_v12, %v1001_v6  ;;  %v1545_v13 = vld [vmem:[%s2220_s8 + $0x10] sm:$0xff]  }
 0x15d   : > { %v1111_v38 = vadd.f32 %v1986_v2, %v1088_v31  ;;  %v1112_v48 = vadd.f32 %v1986_v2, %v1089_v20  ;;  %v877_v42 = vadd.f32 %v861_v40, %v824_v45  ;;  %v1074_v53 = vmul.f32 %v1947_v22, %v1053_v61  ;;  %v1546_v40 = vld [vmem:[%s2220_s8 + $0x18] sm:$0xff]   ;;  %v1547_v61 = vld [vmem:[%s2220_s8 + $0x20] sm:$0xff]  }
 0x15e   : > { %v878_v57 = vadd.f32 %v862_v43, %v825_v37  ;;  %v1075_v21 = vmul.f32 %v1947_v22, %v1054_v0  ;;  %v1544_v22 = vld [vmem:[%s2220_s8 + $0x8] sm:$0xff]   ;;  %v1513_v18 = vunpack.c.l.bf16 %v1512_v9  ;;  %v1514_v35 = vunpack.c.h.bf16 %v1512_v9 }
 0x15f   : > { %v1127_v10 = vmax.f32 %v1111_v38, 0.0  ;;  %v1128_v56 = vmax.f32 %v1112_v48, 0.0  ;;  %v930_v11 = vadd.f32 %v914_v46, %v877_v42  ;;  %v1517_v15 = vunpack.c.l.bf16 %v1544_v22 }
 0x160   : > { %v931_v62 = vadd.f32 %v915_v50, %v878_v57  ;;  %v1518_v41 = vunpack.c.h.bf16 %v1544_v22  ;;  %v1525_v43 = vunpack.c.l.bf16 %v1546_v40  ;;  %v1521_v20 = vunpack.c.l.bf16 %v1545_v13 }
 0x161   : > { %v1143_v39 = vmin.f32 %v1127_v10, 6.0  ;;  %v1144_v24 = vmin.f32 %v1128_v56, 6.0  ;;  %v984_v47 = vadd.f32 %v968_v60, %v930_v11  ;;  %v1526_v37 = vunpack.c.h.bf16 %v1546_v40 }
 0x162   : > { %v985_v55 = vadd.f32 %v969_v29, %v931_v62  ;;  %v1522_v48 = vunpack.c.h.bf16 %v1545_v13  ;;  %v1548_v29 = vld [vmem:[%s2220_s8 + $0x28] sm:$0xff]  }
 0x163   : > { %v1153_v7 = vpack.c.bf16 %v1144_v24, %v1143_v39  ;;  %v1037_v32 = vadd.f32 %v1021_v59, %v984_v47  ;;  %v1533_v10 = vunpack.c.l.bf16 %v1548_v29  ;;  %v1529_v59 = vunpack.c.l.bf16 %v1547_v61 }
 0x164   : > { %v1038_v33 = vadd.f32 %v1022_v3, %v985_v55  ;;  %v1534_v39 = vunpack.c.h.bf16 %v1548_v29  ;;  %v1530_v55 = vunpack.c.h.bf16 %v1547_v61 }
 0x165   : > { %1607 = vmatprep.mubr.msk.bf16.mxu1 %vm574_vm3, %v1153_v7  ;;  %v1090_v49 = vadd.f32 %v1074_v53, %v1037_v32 }
 0x166   : > { %v1091_v51 = vadd.f32 %v1075_v21, %v1038_v33 }
 0x167   : > { %v1113_v52 = vadd.f32 %v1986_v2, %v1090_v49  ;;  %v1550_v49 = vld [vmem:[%s2220_s8 + $0x38] sm:$0xff]  }
 0x168   : > { %v1114_v12 = vadd.f32 %v1986_v2, %v1091_v51  ;;  %v2226_v2 = vld [vmem:[%s2304_s6] ss:$0 sm:$0xff]  ;;  %v1549_v51 = vld [vmem:[%s2220_s8 + $0x30] sm:$0xff]   ;;  %v1542_v22 = vunpack.c.h.bf16 %v1550_v49 }
 0x169   : > { %v1129_v58 = vmax.f32 %v1113_v52, 0.0  ;;  %v1541_v52 = vunpack.c.l.bf16 %v1550_v49 }
 0x16a   : > { %v1130_v63 = vmax.f32 %v1114_v12, 0.0 }
 0x16b   : > { %v1145_v1 = vmin.f32 %v1129_v58, 6.0 }
 0x16c   : > { %v1146_v8 = vmin.f32 %v1130_v63, 6.0  ;;  %v1537_v63 = vunpack.c.l.bf16 %v1549_v51 }
 0x16e   : > { %v1154_v4 = vpack.c.bf16 %v1146_v8, %v1145_v1 }
 0x170   : > { %1608 = vmatmul.mubr.msk.bf16.gmra.mxu1 %vm574_vm3, %v1154_v4 }
 0x1f1   : > { %v1597_v16 = vpop.f32.mrf.mxu1 }
 0x1f2   : > { %v1237_v17 = vadd.f32 %v1597_v16, %v2226_v2 }
 0x1f3   : > { %v1228_v34 = vpop.f32.mrf.mxu1 }
 0x1f4   : > { %v1332_v19 = vadd.f32 %v1517_v15, %v1237_v17  ;;  %v1229_v25 = vadd.f32 %v2226_v2, %v1228_v34  ;;  %v1538_v17 = vunpack.c.h.bf16 %v1549_v51 }
 0x1f5   : > { %v1598_v23 = vpop.f32.mrf.mxu1 }
 0x1f6   : > { %1348 = vst.msk [vmem:[%s1797_s22 + $0x10] sm:$0xff] %vm386_vm1, %v1332_v19  ;;  %v1330_v26 = vadd.f32 %v1513_v18, %v1229_v25  ;;  %v1240_v36 = vadd.f32 %v1598_v23, %v2226_v2 }
 0x1f7   : > { %v1231_v14 = vpop.f32.mrf.mxu1 }
 0x1f8   : > { %1346 = vst.msk [vmem:[%s1797_s22] sm:$0xff] %vm386_vm1, %v1330_v26  ;;  %v1333_v54 = vadd.f32 %v1518_v41, %v1240_v36  ;;  %v1232_v30 = vadd.f32 %v2226_v2, %v1231_v14 }
 0x1fa   : > { %1349 = vst.msk [vmem:[%s1797_s22 + $0x18] sm:$0xff] %vm386_vm1, %v1333_v54  ;;  %v1331_v27 = vadd.f32 %v1514_v35, %v1232_v30 }
 0x1fc   : > { %1347 = vst.msk [vmem:[%s1797_s22 + $0x8] sm:$0xff] %vm386_vm1, %v1331_v27 }
 0x208   : > { %v1601_v5 = vpop.f32.mrf.mxu1 }
 0x209   : > { %v1253_v31 = vadd.f32 %v1601_v5, %v2226_v2 }
 0x20a   : > { %v1244_v45 = vpop.f32.mrf.mxu1 }
 0x20b   : > { %v1336_v46 = vadd.f32 %v1525_v43, %v1253_v31  ;;  %v1245_v28 = vadd.f32 %v2226_v2, %v1244_v45 }
 0x20c   : > { %v1602_v50 = vpop.f32.mrf.mxu1 }
 0x20d   : > { %1352 = vst.msk [vmem:[%s1797_s22 + $0x30] sm:$0xff] %vm386_vm1, %v1336_v46  ;;  %v1334_v44 = vadd.f32 %v1521_v20, %v1245_v28  ;;  %v1256_v38 = vadd.f32 %v1602_v50, %v2226_v2 }
 0x20e   : > { %v1247_v42 = vpop.f32.mrf.mxu1 }
 0x20f   : > { %1350 = vst.msk [vmem:[%s1797_s22 + $0x20] sm:$0xff] %vm386_vm1, %v1334_v44  ;;  %v1337_v60 = vadd.f32 %v1526_v37, %v1256_v38  ;;  %v1248_v6 = vadd.f32 %v2226_v2, %v1247_v42 }
 0x211   : > { %1353 = vst.msk [vmem:[%s1797_s22 + $0x38] sm:$0xff] %vm386_vm1, %v1337_v60  ;;  %v1335_v57 = vadd.f32 %v1522_v48, %v1248_v6 }
 0x213   : > { %1351 = vst.msk [vmem:[%s1797_s22 + $0x28] sm:$0xff] %vm386_vm1, %v1335_v57 }
 0x21a   : > { %v1605_v56 = vpop.f32.mrf.mxu1 }
 0x21b   : > { %v1269_v11 = vadd.f32 %v1605_v56, %v2226_v2 }
 0x21c   : > { %v1260_v0 = vpop.f32.mrf.mxu1 }
 0x21d   : > { %v1340_v62 = vadd.f32 %v1533_v10, %v1269_v11  ;;  %v1261_v3 = vadd.f32 %v2226_v2, %v1260_v0 }
 0x21e   : > { %v1606_v24 = vpop.f32.mrf.mxu1 }
 0x21f   : > { %1356 = vst.msk [vmem:[%s1797_s22 + $0x50] sm:$0xff] %vm386_vm1, %v1340_v62  ;;  %v1338_v47 = vadd.f32 %v1529_v59, %v1261_v3  ;;  %v1272_v53 = vadd.f32 %v1606_v24, %v2226_v2 }
 0x220   : > { %v1263_v21 = vpop.f32.mrf.mxu1 }
 0x221   : > { %1354 = vst.msk [vmem:[%s1797_s22 + $0x40] sm:$0xff] %vm386_vm1, %v1338_v47  ;;  %v1341_v7 = vadd.f32 %v1534_v39, %v1272_v53  ;;  %v1264_v32 = vadd.f32 %v2226_v2, %v1263_v21 }
 0x223   : > { %1357 = vst.msk [vmem:[%s1797_s22 + $0x58] sm:$0xff] %vm386_vm1, %v1341_v7  ;;  %v1339_v33 = vadd.f32 %v1530_v55, %v1264_v32 }
 0x225   : > { %1355 = vst.msk [vmem:[%s1797_s22 + $0x48] sm:$0xff] %vm386_vm1, %v1339_v33 }
 0x230   : > { %v1609_v12 = vpop.f32.mrf.mxu1 }
 0x231   : > { %v1285_v58 = vadd.f32 %v1609_v12, %v2226_v2 }
 0x232   : > { %v1276_v1 = vpop.f32.mrf.mxu1 }
 0x233   : > { %v1344_v8 = vadd.f32 %v1541_v52, %v1285_v58  ;;  %v1277_v4 = vadd.f32 %v2226_v2, %v1276_v1 }
 0x234   : > { %v1610_v9 = vpop.f32.mrf.mxu1 }
 0x235   : > { %1360 = vst.msk [vmem:[%s1797_s22 + $0x70] sm:$0xff] %vm386_vm1, %v1344_v8  ;;  %v1342_v15 = vadd.f32 %v1537_v63, %v1277_v4  ;;  %v1288_v16 = vadd.f32 %v1610_v9, %v2226_v2 }
 0x236   : > { %v1279_v18 = vpop.f32.mrf.mxu1 }
 0x237   : > { %1358 = vst.msk [vmem:[%s1797_s22 + $0x60] sm:$0xff] %vm386_vm1, %v1342_v15  ;;  %v1345_v34 = vadd.f32 %v1542_v22, %v1288_v16  ;;  %v1280_v19 = vadd.f32 %v2226_v2, %v1279_v18 }
 0x239   : > { %1361 = vst.msk [vmem:[%s1797_s22 + $0x78] sm:$0xff] %vm386_vm1, %v1345_v34  ;;  %v1343_v25 = vadd.f32 %v1538_v17, %v1280_v19 }
 0x23b   : > { %1359 = vst.msk [vmem:[%s1797_s22 + $0x68] sm:$0xff] %vm386_vm1, %v1343_v25 }
 0x23c PF: > { %s17_s28 = sadd.s32 1, %s1705_s28   ;;  %s2306_s24 = smov %s1697_s26 }
 0x23d   : > { %p14_p9 = scmp.ge.s32.totalorder %s17_s28, 6   ;;  %s2307_s25 = smov %s1701_s27 }
 0x23e   : > { %s2308_s26 = smov %s2311_s29  ;;  %s2309_s27 = smov %s2315_s30 }
 0x23f   :  { %16 = sbr.rel (!%p14_p9) target bundleno = 3 (0x3), region = 91 }

</bundles_post_ra>
